<compile_context>
chip_gen: v7x
topology: tpu7x:2x2x1
jax: 0.10.0
libtpu: 0.0.40
codegen_flags: <defaults>
</compile_context>

<pallas_src>
import functools

import jax
import jax.numpy as jnp
import numpy as np
from jax import lax
from jax.experimental import pallas as pl
from jax.experimental.pallas import tpu as pltpu


# ----------------------------- Pallas kernel -------------------------------- #
def _repvggdw_kernel(x_ref, w3_ref, mask_ref, *rest, W, deltas, g_mode):
    # x_ref   : (Bblk, C, HW)  packed images; channels on sublanes, pixels on lanes
    # w3_ref  : (9, C, 1)      folded depthwise tap weights (center tap also holds
    #                          grouped-1x1 diagonal + identity residual)
    # mask_ref: (9, 1, HW)     per-pixel zero-padding masks for the shifted taps
    # g_ref   : (ND, C, 1)  [roll path]  or  (C, C)  [mxu path]  or absent
    # bias_ref: (C, 1)         folded per-channel shift
    # o_ref   : (Bblk, C, HW)
    if g_mode == "none":
        bias_ref, o_ref = rest
        g_ref = None
    else:
        g_ref, bias_ref, o_ref = rest

    bblk = x_ref.shape[0]
    bias = bias_ref[...]                                    # (C, 1), f32

    for b in range(bblk):                                   # static unroll, small Bblk
        x = x_ref[b].astype(jnp.float32)                    # (C, HW), f32 accumulate
        C, HW = x.shape

        # Two partial accumulators -> shorter serial VPU dependency chain.
        acc0 = x * w3_ref[4]                                # center tap
        acc1 = None
        par = 0
        for kh in range(3):
            for kw in range(3):
                t = kh * 3 + kw
                if t == 4:
                    continue
                shift = (-((kh - 1) * W + (kw - 1))) % HW
                term = pltpu.roll(x, shift, 1) * w3_ref[t] * mask_ref[t]
                if par == 0:
                    acc0 = acc0 + term
                else:
                    acc1 = term if acc1 is None else acc1 + term
                par ^= 1

        if g_mode == "roll":
            # Off-diagonal grouped-1x1 terms as channel (sublane) rolls; weights
            # are zero across group boundaries so no extra masking is required.
            for i, d in enumerate(deltas):
                term = pltpu.roll(x, d % C, 0) * g_ref[i]
                if i & 1:
                    acc0 = acc0 + term
                else:
                    acc1 = acc1 + term
        elif g_mode == "mxu":
            # Dense block-diagonal (off-diagonal-only) grouped 1x1 on the MXU.
            acc0 = acc0 + jnp.dot(g_ref[...], x,
                                  preferred_element_type=jnp.float32)

        o_ref[b] = (acc0 + acc1 + bias).astype(o_ref.dtype)


# ------------------------- host-side constant folding ------------------------ #
def _fold_params(params, C, H, W, eps=1e-5, mxu_threshold=8):
    G = params["groups"]
    assert C % G == 0, "channel count must be divisible by the group count"
    Cg = C // G

    s1 = params["bn1_gamma"] / jnp.sqrt(params["bn1_var"] + eps)
    t1 = params["bn1_beta"] - params["bn1_mean"] * s1
    s2 = params["bn2_gamma"] / jnp.sqrt(params["bn2_var"] + eps)
    t2 = params["bn2_beta"] - params["bn2_mean"] * s2

    # out = (s1*s2)*dwconv(x) + s2*g1x1(x) + s2*x + [s2*(t1 + b_pw) + t2]
    w_dw = params["w_dw"][:, 0]                               # (C, 3, 3)
    w3 = w_dw * (s1 * s2)[:, None, None]
    w3 = jnp.transpose(w3, (1, 2, 0)).reshape(9, C)

    wpw = params["w_pw"][:, :, 0, 0]                          # (C, Cg) torch layout
    c_idx = jnp.arange(C)
    local_c = c_idx % Cg
    # Grouped-1x1 diagonal + identity residual -> fold into center tap.
    diag = s2 * (wpw[c_idx, local_c] + 1.0)
    w3 = w3.at[4].add(diag)
    w3_taps = w3.reshape(9, C, 1).astype(jnp.float32)

    deltas = tuple(d for d in range(-(Cg - 1), Cg) if d != 0)
    if not deltas:                                            # Cg == 1: no off-diag
        g_mode, g_arr = "none", None
    elif len(deltas) >= mxu_threshold:
        # Dense block-diagonal off-diagonal matrix for the MXU path.
        g_mode = "mxu"
        co = c_idx[:, None]
        ci = c_idx[None, :]
        same_group = (co // Cg) == (ci // Cg)
        off_diag = co != ci
        g_arr = jnp.where(same_group & off_diag,
                          wpw[co, ci % Cg] * s2[:, None],
                          0.0).astype(jnp.float32)
        deltas = ()
    else:
        g_mode = "roll"
        gvecs = []
        for d in deltas:
            local_in = local_c - d
            valid = (local_in >= 0) & (local_in < Cg)
            w = s2 * wpw[c_idx, jnp.clip(local_in, 0, Cg - 1)]
            gvecs.append(jnp.where(valid, w, 0.0))
        g_arr = jnp.stack(gvecs).reshape(len(deltas), C, 1).astype(jnp.float32)

    bias = (s2 * (t1 + params["b_pw"]) + t2).reshape(C, 1).astype(jnp.float32)

    # Zero-padding boundary masks for the 8 shifted taps, flattened to (9,1,HW).
    hh = np.arange(H)[:, None]
    ww = np.arange(W)[None, :]
    masks = []
    for kh in range(3):
        for kw in range(3):
            valid = ((hh + kh - 1 >= 0) & (hh + kh - 1 < H) &
                     (ww + kw - 1 >= 0) & (ww + kw - 1 < W))
            masks.append(valid.astype(np.float32).reshape(H * W))
    masks = jnp.asarray(np.stack(masks)).reshape(9, 1, H * W)

    return w3_taps, masks, bias, g_mode, g_arr, deltas


def _choose_batch_block(B, per_image_bytes, target_bytes=2 << 20, max_bblk=8):
    """Largest batch-packing factor with block <= ~2 MiB and >= 2 grid steps."""
    best = 1
    for cand in range(1, min(B, max_bblk) + 1):
        if B % cand:
            continue
        if cand * per_image_bytes > target_bytes:
            break
        if B // cand >= 2 or B == 1:
            best = cand
    return best


# ------------------------------- wrapper ------------------------------------ #
def repvggdw_pallas(x_nchw, params):
    B, C, H, W = x_nchw.shape
    HW = H * W
    dtype = x_nchw.dtype

    w3_taps, masks, bias, g_mode, g_arr, deltas = _fold_params(params, C, H, W)

    # NCHW -> (B, C, H*W): a contiguous reshape (no transpose, no pad, no cast).
    x_flat = x_nchw.reshape(B, C, HW)

    per_img = C * HW * x_flat.dtype.itemsize
    bblk = _choose_batch_block(B, per_img)
    grid = (B // bblk,)

    kernel = functools.partial(_repvggdw_kernel, W=W, deltas=deltas, g_mode=g_mode)

    in_specs = [
        pl.BlockSpec((bblk, C, HW), lambda i: (i, 0, 0)),
        pl.BlockSpec((9, C, 1), lambda i: (0, 0, 0)),
        pl.BlockSpec((9, 1, HW), lambda i: (0, 0, 0)),
    ]
    operands = [x_flat, w3_taps, masks]
    const_bytes = (w3_taps.size + masks.size + bias.size) * 4
    if g_mode == "roll":
        nd = g_arr.shape[0]
        in_specs.append(pl.BlockSpec((nd, C, 1), lambda i: (0, 0, 0)))
        operands.append(g_arr)
        const_bytes += g_arr.size * 4
    elif g_mode == "mxu":
        in_specs.append(pl.BlockSpec((C, C), lambda i: (0, 0)))
        operands.append(g_arr)
        const_bytes += g_arr.size * 4
    in_specs.append(pl.BlockSpec((C, 1), lambda i: (0, 0)))
    operands.append(bias)

    # VMEM budget: 2x double-buffered input + 2x output block + constants + slack,
    # clamped to [32 MiB, 64 MiB] so it is valid on v5e/v6e/v7x alike.
    block_bytes = bblk * per_img
    vmem_need = 4 * block_bytes + 2 * const_bytes + (4 << 20)
    vmem_limit = int(min(max(vmem_need, 32 << 20), 64 << 20))

    out_flat = pl.pallas_call(
        kernel,
        out_shape=jax.ShapeDtypeStruct((B, C, HW), dtype),
        grid=grid,
        in_specs=in_specs,
        out_specs=pl.BlockSpec((bblk, C, HW), lambda i: (i, 0, 0)),
        compiler_params=pltpu.CompilerParams(
            dimension_semantics=("parallel",),
            vmem_limit_bytes=vmem_limit),
    )(*operands)

    return out_flat.reshape(B, C, H, W)


# ----------------------- pure-JAX reference (NCHW) --------------------------- #
def repvggdw_reference(x, params):
    B, C, H, W = x.shape
    G = params["groups"]
    eps = 1e-5

    dn = lax.conv_dimension_numbers(x.shape, params["w_dw"].shape,
                                    ("NCHW", "OIHW", "NCHW"))
    y3 = lax.conv_general_dilated(x, params["w_dw"], (1, 1), ((1, 1), (1, 1)),
                                  dimension_numbers=dn, feature_group_count=C)
    s1 = params["bn1_gamma"] / jnp.sqrt(params["bn1_var"] + eps)
    t1 = params["bn1_beta"] - params["bn1_mean"] * s1
    y3 = y3 * s1[None, :, None, None] + t1[None, :, None, None]

    dn1 = lax.conv_dimension_numbers(x.shape, params["w_pw"].shape,
                                     ("NCHW", "OIHW", "NCHW"))
    y1 = lax.conv_general_dilated(x, params["w_pw"], (1, 1), ((0, 0), (0, 0)),
                                  dimension_numbers=dn1, feature_group_count=G)
    y1 = y1 + params["b_pw"][None, :, None, None]

    y = y3 + y1 + x
    s2 = params["bn2_gamma"] / jnp.sqrt(params["bn2_var"] + eps)
    t2 = params["bn2_beta"] - params["bn2_mean"] * s2
    return y * s2[None, :, None, None] + t2[None, :, None, None]


def _make_params(key, ed):
    G = min(ed, 16)
    Cg = ed // G
    ks = jax.random.split(key, 7)
    return {
        "groups": G,
        "w_dw": 0.1 * jax.random.normal(ks[0], (ed, 1, 3, 3), jnp.float32),
        "bn1_gamma": jnp.ones((ed,), jnp.float32),
        "bn1_beta": jnp.zeros((ed,), jnp.float32),
        "bn1_mean": 0.1 * jax.random.normal(ks[1], (ed,), jnp.float32),
        "bn1_var": jax.random.uniform(ks[2], (ed,), jnp.float32, 0.5, 1.5),
        "w_pw": 0.1 * jax.random.normal(ks[3], (ed, Cg, 1, 1), jnp.float32),
        "b_pw": 0.05 * jax.random.normal(ks[4], (ed,), jnp.float32),
        "bn2_gamma": jnp.ones((ed,), jnp.float32),
        "bn2_beta": jnp.zeros((ed,), jnp.float32),
        "bn2_mean": 0.1 * jax.random.normal(ks[5], (ed,), jnp.float32),
        "bn2_var": jax.random.uniform(ks[6], (ed,), jnp.float32, 0.5, 1.5),
    }


# --------------------------------- main -------------------------------------- #
if __name__ == "__main__":
    key = jax.random.PRNGKey(0)
    kA, kxA, kB, kxB, kC, kxC = jax.random.split(key, 6)

    # Config A: Cg = 2 -> sublane-roll grouped-1x1 path, batch-packed blocks
    # (B = 4, Bblk = 2 -> 2 parallel grid steps).
    paramsA = _make_params(kA, 32)
    xA = jax.random.normal(kxA, (4, 32, 16, 16), jnp.float32)
    outA = jax.block_until_ready(repvggdw_pallas(xA, paramsA))
    refA = repvggdw_reference(xA, paramsA)
    np.testing.assert_allclose(np.asarray(outA), np.asarray(refA),
                               rtol=1e-4, atol=1e-4)

    # Config B: Cg = 8 -> dense block-diagonal grouped-1x1 on the MXU.
    # (Looser tolerance: MXU / XLA conv may use reduced-precision passes.)
    paramsB = _make_params(kB, 128)
    xB = jax.random.normal(kxB, (2, 128, 16, 16), jnp.float32)
    outB = jax.block_until_ready(repvggdw_pallas(xB, paramsB))
    refB = repvggdw_reference(xB, paramsB)
    np.testing.assert_allclose(np.asarray(outB), np.asarray(refB),
                               rtol=1e-2, atol=1e-2)

    # Config C: native bf16 activations (f32 accumulation inside the kernel).
    paramsC = _make_params(kC, 32)
    xC = jax.random.normal(kxC, (2, 32, 16, 16), jnp.float32).astype(jnp.bfloat16)
    outC = jax.block_until_ready(repvggdw_pallas(xC, paramsC))
    refC = repvggdw_reference(xC.astype(jnp.float32), paramsC)
    np.testing.assert_allclose(np.asarray(outC, dtype=np.float32), np.asarray(refC),
                               rtol=3e-2, atol=3e-2)

    print("KERNEL_OK")
</pallas_src>

<mosaic_0001>
module attributes {stable_mosaic.version = 11 : i64} {
  func.func @_repvggdw_kernel(%arg0: i32, %arg1: memref<2x32x256xf32, #tpu.memory_space<vmem>>, %arg2: memref<9x32x1xf32, #tpu.memory_space<vmem>>, %arg3: memref<9x1x256xf32, #tpu.memory_space<vmem>>, %arg4: memref<2x32x1xf32, #tpu.memory_space<vmem>>, %arg5: memref<32x1xf32, #tpu.memory_space<vmem>>, %arg6: memref<2x32x256xf32, #tpu.memory_space<vmem>>) attributes {dimension_semantics = [#tpu.dimension_semantics<parallel>], iteration_bounds = array<i64: 2>, scalar_prefetch = 0 : i64, scratch_operands = 0 : i64, tpu.core_type = #tpu.core_type<tc>, window_params = [{transform_indices = @transform_0, window_bounds = array<i64: 2, 32, 256>}, {pipeline_mode = #tpu.pipeline_mode<synchronous>, transform_indices = @transform_1, window_bounds = array<i64: 9, 32, 1>}, {pipeline_mode = #tpu.pipeline_mode<synchronous>, transform_indices = @transform_2, window_bounds = array<i64: 9, 1, 256>}, {pipeline_mode = #tpu.pipeline_mode<synchronous>, transform_indices = @transform_3, window_bounds = array<i64: 2, 32, 1>}, {pipeline_mode = #tpu.pipeline_mode<synchronous>, transform_indices = @transform_4, window_bounds = array<i64: 32, 1>}, {transform_indices = @transform_5, window_bounds = array<i64: 2, 32, 256>}]} {
    %c0 = arith.constant 0 : index
    %c0_0 = arith.constant 0 : index
    %0 = vector.load %arg5[%c0, %c0_0] : memref<32x1xf32, #tpu.memory_space<vmem>>, vector<32x1xf32>
    %c0_1 = arith.constant 0 : index
    %c0_2 = arith.constant 0 : index
    %c0_3 = arith.constant 0 : index
    %1 = vector.load %arg1[%c0_1, %c0_2, %c0_3] : memref<2x32x256xf32, #tpu.memory_space<vmem>>, vector<1x32x256xf32>
    %2 = vector.shape_cast %1 : vector<1x32x256xf32> to vector<32x256xf32>
    %c4 = arith.constant 4 : index
    %c0_4 = arith.constant 0 : index
    %c0_5 = arith.constant 0 : index
    %3 = vector.load %arg2[%c4, %c0_4, %c0_5] : memref<9x32x1xf32, #tpu.memory_space<vmem>>, vector<1x32x1xf32>
    %4 = vector.shape_cast %3 : vector<1x32x1xf32> to vector<32x1xf32>
    %5 = vector.broadcast %4 : vector<32x1xf32> to vector<32x256xf32>
    %6 = arith.mulf %2, %5 : vector<32x256xf32>
    %c17_i32 = arith.constant 17 : i32
    %7 = tpu.dynamic_rotate %2 by %c17_i32 dim 1 : vector<32x256xf32>, i32 -> vector<32x256xf32>
    %c0_6 = arith.constant 0 : index
    %c0_7 = arith.constant 0 : index
    %c0_8 = arith.constant 0 : index
    %8 = vector.load %arg2[%c0_6, %c0_7, %c0_8] : memref<9x32x1xf32, #tpu.memory_space<vmem>>, vector<1x32x1xf32>
    %9 = vector.shape_cast %8 : vector<1x32x1xf32> to vector<32x1xf32>
    %10 = vector.broadcast %9 : vector<32x1xf32> to vector<32x256xf32>
    %11 = arith.mulf %7, %10 : vector<32x256xf32>
    %c0_9 = arith.constant 0 : index
    %c0_10 = arith.constant 0 : index
    %c0_11 = arith.constant 0 : index
    %12 = vector.load %arg3[%c0_9, %c0_10, %c0_11] : memref<9x1x256xf32, #tpu.memory_space<vmem>>, vector<1x1x256xf32>
    %13 = vector.shape_cast %12 : vector<1x1x256xf32> to vector<1x256xf32>
    %14 = vector.broadcast %13 : vector<1x256xf32> to vector<32x256xf32>
    %15 = arith.mulf %11, %14 : vector<32x256xf32>
    %16 = arith.addf %6, %15 : vector<32x256xf32>
    %c16_i32 = arith.constant 16 : i32
    %17 = tpu.dynamic_rotate %2 by %c16_i32 dim 1 : vector<32x256xf32>, i32 -> vector<32x256xf32>
    %c1 = arith.constant 1 : index
    %c0_12 = arith.constant 0 : index
    %c0_13 = arith.constant 0 : index
    %18 = vector.load %arg2[%c1, %c0_12, %c0_13] : memref<9x32x1xf32, #tpu.memory_space<vmem>>, vector<1x32x1xf32>
    %19 = vector.shape_cast %18 : vector<1x32x1xf32> to vector<32x1xf32>
    %20 = vector.broadcast %19 : vector<32x1xf32> to vector<32x256xf32>
    %21 = arith.mulf %17, %20 : vector<32x256xf32>
    %c1_14 = arith.constant 1 : index
    %c0_15 = arith.constant 0 : index
    %c0_16 = arith.constant 0 : index
    %22 = vector.load %arg3[%c1_14, %c0_15, %c0_16] : memref<9x1x256xf32, #tpu.memory_space<vmem>>, vector<1x1x256xf32>
    %23 = vector.shape_cast %22 : vector<1x1x256xf32> to vector<1x256xf32>
    %24 = vector.broadcast %23 : vector<1x256xf32> to vector<32x256xf32>
    %25 = arith.mulf %21, %24 : vector<32x256xf32>
    %c15_i32 = arith.constant 15 : i32
    %26 = tpu.dynamic_rotate %2 by %c15_i32 dim 1 : vector<32x256xf32>, i32 -> vector<32x256xf32>
    %c2 = arith.constant 2 : index
    %c0_17 = arith.constant 0 : index
    %c0_18 = arith.constant 0 : index
    %27 = vector.load %arg2[%c2, %c0_17, %c0_18] : memref<9x32x1xf32, #tpu.memory_space<vmem>>, vector<1x32x1xf32>
    %28 = vector.shape_cast %27 : vector<1x32x1xf32> to vector<32x1xf32>
    %29 = vector.broadcast %28 : vector<32x1xf32> to vector<32x256xf32>
    %30 = arith.mulf %26, %29 : vector<32x256xf32>
    %c2_19 = arith.constant 2 : index
    %c0_20 = arith.constant 0 : index
    %c0_21 = arith.constant 0 : index
    %31 = vector.load %arg3[%c2_19, %c0_20, %c0_21] : memref<9x1x256xf32, #tpu.memory_space<vmem>>, vector<1x1x256xf32>
    %32 = vector.shape_cast %31 : vector<1x1x256xf32> to vector<1x256xf32>
    %33 = vector.broadcast %32 : vector<1x256xf32> to vector<32x256xf32>
    %34 = arith.mulf %30, %33 : vector<32x256xf32>
    %35 = arith.addf %16, %34 : vector<32x256xf32>
    %c1_i32 = arith.constant 1 : i32
    %36 = tpu.dynamic_rotate %2 by %c1_i32 dim 1 : vector<32x256xf32>, i32 -> vector<32x256xf32>
    %c3 = arith.constant 3 : index
    %c0_22 = arith.constant 0 : index
    %c0_23 = arith.constant 0 : index
    %37 = vector.load %arg2[%c3, %c0_22, %c0_23] : memref<9x32x1xf32, #tpu.memory_space<vmem>>, vector<1x32x1xf32>
    %38 = vector.shape_cast %37 : vector<1x32x1xf32> to vector<32x1xf32>
    %39 = vector.broadcast %38 : vector<32x1xf32> to vector<32x256xf32>
    %40 = arith.mulf %36, %39 : vector<32x256xf32>
    %c3_24 = arith.constant 3 : index
    %c0_25 = arith.constant 0 : index
    %c0_26 = arith.constant 0 : index
    %41 = vector.load %arg3[%c3_24, %c0_25, %c0_26] : memref<9x1x256xf32, #tpu.memory_space<vmem>>, vector<1x1x256xf32>
    %42 = vector.shape_cast %41 : vector<1x1x256xf32> to vector<1x256xf32>
    %43 = vector.broadcast %42 : vector<1x256xf32> to vector<32x256xf32>
    %44 = arith.mulf %40, %43 : vector<32x256xf32>
    %45 = arith.addf %25, %44 : vector<32x256xf32>
    %c255_i32 = arith.constant 255 : i32
    %46 = tpu.dynamic_rotate %2 by %c255_i32 dim 1 : vector<32x256xf32>, i32 -> vector<32x256xf32>
    %c5 = arith.constant 5 : index
    %c0_27 = arith.constant 0 : index
    %c0_28 = arith.constant 0 : index
    %47 = vector.load %arg2[%c5, %c0_27, %c0_28] : memref<9x32x1xf32, #tpu.memory_space<vmem>>, vector<1x32x1xf32>
    %48 = vector.shape_cast %47 : vector<1x32x1xf32> to vector<32x1xf32>
    %49 = vector.broadcast %48 : vector<32x1xf32> to vector<32x256xf32>
    %50 = arith.mulf %46, %49 : vector<32x256xf32>
    %c5_29 = arith.constant 5 : index
    %c0_30 = arith.constant 0 : index
    %c0_31 = arith.constant 0 : index
    %51 = vector.load %arg3[%c5_29, %c0_30, %c0_31] : memref<9x1x256xf32, #tpu.memory_space<vmem>>, vector<1x1x256xf32>
    %52 = vector.shape_cast %51 : vector<1x1x256xf32> to vector<1x256xf32>
    %53 = vector.broadcast %52 : vector<1x256xf32> to vector<32x256xf32>
    %54 = arith.mulf %50, %53 : vector<32x256xf32>
    %55 = arith.addf %35, %54 : vector<32x256xf32>
    %c241_i32 = arith.constant 241 : i32
    %56 = tpu.dynamic_rotate %2 by %c241_i32 dim 1 : vector<32x256xf32>, i32 -> vector<32x256xf32>
    %c6 = arith.constant 6 : index
    %c0_32 = arith.constant 0 : index
    %c0_33 = arith.constant 0 : index
    %57 = vector.load %arg2[%c6, %c0_32, %c0_33] : memref<9x32x1xf32, #tpu.memory_space<vmem>>, vector<1x32x1xf32>
    %58 = vector.shape_cast %57 : vector<1x32x1xf32> to vector<32x1xf32>
    %59 = vector.broadcast %58 : vector<32x1xf32> to vector<32x256xf32>
    %60 = arith.mulf %56, %59 : vector<32x256xf32>
    %c6_34 = arith.constant 6 : index
    %c0_35 = arith.constant 0 : index
    %c0_36 = arith.constant 0 : index
    %61 = vector.load %arg3[%c6_34, %c0_35, %c0_36] : memref<9x1x256xf32, #tpu.memory_space<vmem>>, vector<1x1x256xf32>
    %62 = vector.shape_cast %61 : vector<1x1x256xf32> to vector<1x256xf32>
    %63 = vector.broadcast %62 : vector<1x256xf32> to vector<32x256xf32>
    %64 = arith.mulf %60, %63 : vector<32x256xf32>
    %65 = arith.addf %45, %64 : vector<32x256xf32>
    %c240_i32 = arith.constant 240 : i32
    %66 = tpu.dynamic_rotate %2 by %c240_i32 dim 1 : vector<32x256xf32>, i32 -> vector<32x256xf32>
    %c7 = arith.constant 7 : index
    %c0_37 = arith.constant 0 : index
    %c0_38 = arith.constant 0 : index
    %67 = vector.load %arg2[%c7, %c0_37, %c0_38] : memref<9x32x1xf32, #tpu.memory_space<vmem>>, vector<1x32x1xf32>
    %68 = vector.shape_cast %67 : vector<1x32x1xf32> to vector<32x1xf32>
    %69 = vector.broadcast %68 : vector<32x1xf32> to vector<32x256xf32>
    %70 = arith.mulf %66, %69 : vector<32x256xf32>
    %c7_39 = arith.constant 7 : index
    %c0_40 = arith.constant 0 : index
    %c0_41 = arith.constant 0 : index
    %71 = vector.load %arg3[%c7_39, %c0_40, %c0_41] : memref<9x1x256xf32, #tpu.memory_space<vmem>>, vector<1x1x256xf32>
    %72 = vector.shape_cast %71 : vector<1x1x256xf32> to vector<1x256xf32>
    %73 = vector.broadcast %72 : vector<1x256xf32> to vector<32x256xf32>
    %74 = arith.mulf %70, %73 : vector<32x256xf32>
    %75 = arith.addf %55, %74 : vector<32x256xf32>
    %c239_i32 = arith.constant 239 : i32
    %76 = tpu.dynamic_rotate %2 by %c239_i32 dim 1 : vector<32x256xf32>, i32 -> vector<32x256xf32>
    %c8 = arith.constant 8 : index
    %c0_42 = arith.constant 0 : index
    %c0_43 = arith.constant 0 : index
    %77 = vector.load %arg2[%c8, %c0_42, %c0_43] : memref<9x32x1xf32, #tpu.memory_space<vmem>>, vector<1x32x1xf32>
    %78 = vector.shape_cast %77 : vector<1x32x1xf32> to vector<32x1xf32>
    %79 = vector.broadcast %78 : vector<32x1xf32> to vector<32x256xf32>
    %80 = arith.mulf %76, %79 : vector<32x256xf32>
    %c8_44 = arith.constant 8 : index
    %c0_45 = arith.constant 0 : index
    %c0_46 = arith.constant 0 : index
    %81 = vector.load %arg3[%c8_44, %c0_45, %c0_46] : memref<9x1x256xf32, #tpu.memory_space<vmem>>, vector<1x1x256xf32>
    %82 = vector.shape_cast %81 : vector<1x1x256xf32> to vector<1x256xf32>
    %83 = vector.broadcast %82 : vector<1x256xf32> to vector<32x256xf32>
    %84 = arith.mulf %80, %83 : vector<32x256xf32>
    %85 = arith.addf %65, %84 : vector<32x256xf32>
    %c31_i32 = arith.constant 31 : i32
    %86 = tpu.dynamic_rotate %2 by %c31_i32 dim 0 : vector<32x256xf32>, i32 -> vector<32x256xf32>
    %c0_47 = arith.constant 0 : index
    %c0_48 = arith.constant 0 : index
    %c0_49 = arith.constant 0 : index
    %87 = vector.load %arg4[%c0_47, %c0_48, %c0_49] : memref<2x32x1xf32, #tpu.memory_space<vmem>>, vector<1x32x1xf32>
    %88 = vector.shape_cast %87 : vector<1x32x1xf32> to vector<32x1xf32>
    %89 = vector.broadcast %88 : vector<32x1xf32> to vector<32x256xf32>
    %90 = arith.mulf %86, %89 : vector<32x256xf32>
    %91 = arith.addf %85, %90 : vector<32x256xf32>
    %c1_i32_50 = arith.constant 1 : i32
    %92 = tpu.dynamic_rotate %2 by %c1_i32_50 dim 0 : vector<32x256xf32>, i32 -> vector<32x256xf32>
    %c1_51 = arith.constant 1 : index
    %c0_52 = arith.constant 0 : index
    %c0_53 = arith.constant 0 : index
    %93 = vector.load %arg4[%c1_51, %c0_52, %c0_53] : memref<2x32x1xf32, #tpu.memory_space<vmem>>, vector<1x32x1xf32>
    %94 = vector.shape_cast %93 : vector<1x32x1xf32> to vector<32x1xf32>
    %95 = vector.broadcast %94 : vector<32x1xf32> to vector<32x256xf32>
    %96 = arith.mulf %92, %95 : vector<32x256xf32>
    %97 = arith.addf %75, %96 : vector<32x256xf32>
    %98 = arith.addf %97, %91 : vector<32x256xf32>
    %99 = vector.broadcast %0 : vector<32x1xf32> to vector<32x256xf32>
    %100 = arith.addf %98, %99 : vector<32x256xf32>
    %c0_54 = arith.constant 0 : index
    %c0_55 = arith.constant 0 : index
    %c0_56 = arith.constant 0 : index
    %101 = vector.load %arg6[%c0_54, %c0_55, %c0_56] : memref<2x32x256xf32, #tpu.memory_space<vmem>>, vector<1x32x256xf32>
    %102 = vector.shape_cast %101 : vector<1x32x256xf32> to vector<32x256xf32>
    %103 = vector.shape_cast %100 : vector<32x256xf32> to vector<1x32x256xf32>
    tpu.vector_store %arg6[%c0_54, %c0_55, %c0_56], %103 {strides = array<i32>} : memref<2x32x256xf32, #tpu.memory_space<vmem>>, vector<1x32x256xf32>,
    %c1_57 = arith.constant 1 : index
    %c0_58 = arith.constant 0 : index
    %c0_59 = arith.constant 0 : index
    %104 = vector.load %arg1[%c1_57, %c0_58, %c0_59] : memref<2x32x256xf32, #tpu.memory_space<vmem>>, vector<1x32x256xf32>
    %105 = vector.shape_cast %104 : vector<1x32x256xf32> to vector<32x256xf32>
    %c4_60 = arith.constant 4 : index
    %c0_61 = arith.constant 0 : index
    %c0_62 = arith.constant 0 : index
    %106 = vector.load %arg2[%c4_60, %c0_61, %c0_62] : memref<9x32x1xf32, #tpu.memory_space<vmem>>, vector<1x32x1xf32>
    %107 = vector.shape_cast %106 : vector<1x32x1xf32> to vector<32x1xf32>
    %108 = vector.broadcast %107 : vector<32x1xf32> to vector<32x256xf32>
    %109 = arith.mulf %105, %108 : vector<32x256xf32>
    %c17_i32_63 = arith.constant 17 : i32
    %110 = tpu.dynamic_rotate %105 by %c17_i32_63 dim 1 : vector<32x256xf32>, i32 -> vector<32x256xf32>
    %c0_64 = arith.constant 0 : index
    %c0_65 = arith.constant 0 : index
    %c0_66 = arith.constant 0 : index
    %111 = vector.load %arg2[%c0_64, %c0_65, %c0_66] : memref<9x32x1xf32, #tpu.memory_space<vmem>>, vector<1x32x1xf32>
    %112 = vector.shape_cast %111 : vector<1x32x1xf32> to vector<32x1xf32>
    %113 = vector.broadcast %112 : vector<32x1xf32> to vector<32x256xf32>
    %114 = arith.mulf %110, %113 : vector<32x256xf32>
    %c0_67 = arith.constant 0 : index
    %c0_68 = arith.constant 0 : index
    %c0_69 = arith.constant 0 : index
    %115 = vector.load %arg3[%c0_67, %c0_68, %c0_69] : memref<9x1x256xf32, #tpu.memory_space<vmem>>, vector<1x1x256xf32>
    %116 = vector.shape_cast %115 : vector<1x1x256xf32> to vector<1x256xf32>
    %117 = vector.broadcast %116 : vector<1x256xf32> to vector<32x256xf32>
    %118 = arith.mulf %114, %117 : vector<32x256xf32>
    %119 = arith.addf %109, %118 : vector<32x256xf32>
    %c16_i32_70 = arith.constant 16 : i32
    %120 = tpu.dynamic_rotate %105 by %c16_i32_70 dim 1 : vector<32x256xf32>, i32 -> vector<32x256xf32>
    %c1_71 = arith.constant 1 : index
    %c0_72 = arith.constant 0 : index
    %c0_73 = arith.constant 0 : index
    %121 = vector.load %arg2[%c1_71, %c0_72, %c0_73] : memref<9x32x1xf32, #tpu.memory_space<vmem>>, vector<1x32x1xf32>
    %122 = vector.shape_cast %121 : vector<1x32x1xf32> to vector<32x1xf32>
    %123 = vector.broadcast %122 : vector<32x1xf32> to vector<32x256xf32>
    %124 = arith.mulf %120, %123 : vector<32x256xf32>
    %c1_74 = arith.constant 1 : index
    %c0_75 = arith.constant 0 : index
    %c0_76 = arith.constant 0 : index
    %125 = vector.load %arg3[%c1_74, %c0_75, %c0_76] : memref<9x1x256xf32, #tpu.memory_space<vmem>>, vector<1x1x256xf32>
    %126 = vector.shape_cast %125 : vector<1x1x256xf32> to vector<1x256xf32>
    %127 = vector.broadcast %126 : vector<1x256xf32> to vector<32x256xf32>
    %128 = arith.mulf %124, %127 : vector<32x256xf32>
    %c15_i32_77 = arith.constant 15 : i32
    %129 = tpu.dynamic_rotate %105 by %c15_i32_77 dim 1 : vector<32x256xf32>, i32 -> vector<32x256xf32>
    %c2_78 = arith.constant 2 : index
    %c0_79 = arith.constant 0 : index
    %c0_80 = arith.constant 0 : index
    %130 = vector.load %arg2[%c2_78, %c0_79, %c0_80] : memref<9x32x1xf32, #tpu.memory_space<vmem>>, vector<1x32x1xf32>
    %131 = vector.shape_cast %130 : vector<1x32x1xf32> to vector<32x1xf32>
    %132 = vector.broadcast %131 : vector<32x1xf32> to vector<32x256xf32>
    %133 = arith.mulf %129, %132 : vector<32x256xf32>
    %c2_81 = arith.constant 2 : index
    %c0_82 = arith.constant 0 : index
    %c0_83 = arith.constant 0 : index
    %134 = vector.load %arg3[%c2_81, %c0_82, %c0_83] : memref<9x1x256xf32, #tpu.memory_space<vmem>>, vector<1x1x256xf32>
    %135 = vector.shape_cast %134 : vector<1x1x256xf32> to vector<1x256xf32>
    %136 = vector.broadcast %135 : vector<1x256xf32> to vector<32x256xf32>
    %137 = arith.mulf %133, %136 : vector<32x256xf32>
    %138 = arith.addf %119, %137 : vector<32x256xf32>
    %c1_i32_84 = arith.constant 1 : i32
    %139 = tpu.dynamic_rotate %105 by %c1_i32_84 dim 1 : vector<32x256xf32>, i32 -> vector<32x256xf32>
    %c3_85 = arith.constant 3 : index
    %c0_86 = arith.constant 0 : index
    %c0_87 = arith.constant 0 : index
    %140 = vector.load %arg2[%c3_85, %c0_86, %c0_87] : memref<9x32x1xf32, #tpu.memory_space<vmem>>, vector<1x32x1xf32>
    %141 = vector.shape_cast %140 : vector<1x32x1xf32> to vector<32x1xf32>
    %142 = vector.broadcast %141 : vector<32x1xf32> to vector<32x256xf32>
    %143 = arith.mulf %139, %142 : vector<32x256xf32>
    %c3_88 = arith.constant 3 : index
    %c0_89 = arith.constant 0 : index
    %c0_90 = arith.constant 0 : index
    %144 = vector.load %arg3[%c3_88, %c0_89, %c0_90] : memref<9x1x256xf32, #tpu.memory_space<vmem>>, vector<1x1x256xf32>
    %145 = vector.shape_cast %144 : vector<1x1x256xf32> to vector<1x256xf32>
    %146 = vector.broadcast %145 : vector<1x256xf32> to vector<32x256xf32>
    %147 = arith.mulf %143, %146 : vector<32x256xf32>
    %148 = arith.addf %128, %147 : vector<32x256xf32>
    %c255_i32_91 = arith.constant 255 : i32
    %149 = tpu.dynamic_rotate %105 by %c255_i32_91 dim 1 : vector<32x256xf32>, i32 -> vector<32x256xf32>
    %c5_92 = arith.constant 5 : index
    %c0_93 = arith.constant 0 : index
    %c0_94 = arith.constant 0 : index
    %150 = vector.load %arg2[%c5_92, %c0_93, %c0_94] : memref<9x32x1xf32, #tpu.memory_space<vmem>>, vector<1x32x1xf32>
    %151 = vector.shape_cast %150 : vector<1x32x1xf32> to vector<32x1xf32>
    %152 = vector.broadcast %151 : vector<32x1xf32> to vector<32x256xf32>
    %153 = arith.mulf %149, %152 : vector<32x256xf32>
    %c5_95 = arith.constant 5 : index
    %c0_96 = arith.constant 0 : index
    %c0_97 = arith.constant 0 : index
    %154 = vector.load %arg3[%c5_95, %c0_96, %c0_97] : memref<9x1x256xf32, #tpu.memory_space<vmem>>, vector<1x1x256xf32>
    %155 = vector.shape_cast %154 : vector<1x1x256xf32> to vector<1x256xf32>
    %156 = vector.broadcast %155 : vector<1x256xf32> to vector<32x256xf32>
    %157 = arith.mulf %153, %156 : vector<32x256xf32>
    %158 = arith.addf %138, %157 : vector<32x256xf32>
    %c241_i32_98 = arith.constant 241 : i32
    %159 = tpu.dynamic_rotate %105 by %c241_i32_98 dim 1 : vector<32x256xf32>, i32 -> vector<32x256xf32>
    %c6_99 = arith.constant 6 : index
    %c0_100 = arith.constant 0 : index
    %c0_101 = arith.constant 0 : index
    %160 = vector.load %arg2[%c6_99, %c0_100, %c0_101] : memref<9x32x1xf32, #tpu.memory_space<vmem>>, vector<1x32x1xf32>
    %161 = vector.shape_cast %160 : vector<1x32x1xf32> to vector<32x1xf32>
    %162 = vector.broadcast %161 : vector<32x1xf32> to vector<32x256xf32>
    %163 = arith.mulf %159, %162 : vector<32x256xf32>
    %c6_102 = arith.constant 6 : index
    %c0_103 = arith.constant 0 : index
    %c0_104 = arith.constant 0 : index
    %164 = vector.load %arg3[%c6_102, %c0_103, %c0_104] : memref<9x1x256xf32, #tpu.memory_space<vmem>>, vector<1x1x256xf32>
    %165 = vector.shape_cast %164 : vector<1x1x256xf32> to vector<1x256xf32>
    %166 = vector.broadcast %165 : vector<1x256xf32> to vector<32x256xf32>
    %167 = arith.mulf %163, %166 : vector<32x256xf32>
    %168 = arith.addf %148, %167 : vector<32x256xf32>
    %c240_i32_105 = arith.constant 240 : i32
    %169 = tpu.dynamic_rotate %105 by %c240_i32_105 dim 1 : vector<32x256xf32>, i32 -> vector<32x256xf32>
    %c7_106 = arith.constant 7 : index
    %c0_107 = arith.constant 0 : index
    %c0_108 = arith.constant 0 : index
    %170 = vector.load %arg2[%c7_106, %c0_107, %c0_108] : memref<9x32x1xf32, #tpu.memory_space<vmem>>, vector<1x32x1xf32>
    %171 = vector.shape_cast %170 : vector<1x32x1xf32> to vector<32x1xf32>
    %172 = vector.broadcast %171 : vector<32x1xf32> to vector<32x256xf32>
    %173 = arith.mulf %169, %172 : vector<32x256xf32>
    %c7_109 = arith.constant 7 : index
    %c0_110 = arith.constant 0 : index
    %c0_111 = arith.constant 0 : index
    %174 = vector.load %arg3[%c7_109, %c0_110, %c0_111] : memref<9x1x256xf32, #tpu.memory_space<vmem>>, vector<1x1x256xf32>
    %175 = vector.shape_cast %174 : vector<1x1x256xf32> to vector<1x256xf32>
    %176 = vector.broadcast %175 : vector<1x256xf32> to vector<32x256xf32>
    %177 = arith.mulf %173, %176 : vector<32x256xf32>
    %178 = arith.addf %158, %177 : vector<32x256xf32>
    %c239_i32_112 = arith.constant 239 : i32
    %179 = tpu.dynamic_rotate %105 by %c239_i32_112 dim 1 : vector<32x256xf32>, i32 -> vector<32x256xf32>
    %c8_113 = arith.constant 8 : index
    %c0_114 = arith.constant 0 : index
    %c0_115 = arith.constant 0 : index
    %180 = vector.load %arg2[%c8_113, %c0_114, %c0_115] : memref<9x32x1xf32, #tpu.memory_space<vmem>>, vector<1x32x1xf32>
    %181 = vector.shape_cast %180 : vector<1x32x1xf32> to vector<32x1xf32>
    %182 = vector.broadcast %181 : vector<32x1xf32> to vector<32x256xf32>
    %183 = arith.mulf %179, %182 : vector<32x256xf32>
    %c8_116 = arith.constant 8 : index
    %c0_117 = arith.constant 0 : index
    %c0_118 = arith.constant 0 : index
    %184 = vector.load %arg3[%c8_116, %c0_117, %c0_118] : memref<9x1x256xf32, #tpu.memory_space<vmem>>, vector<1x1x256xf32>
    %185 = vector.shape_cast %184 : vector<1x1x256xf32> to vector<1x256xf32>
    %186 = vector.broadcast %185 : vector<1x256xf32> to vector<32x256xf32>
    %187 = arith.mulf %183, %186 : vector<32x256xf32>
    %188 = arith.addf %168, %187 : vector<32x256xf32>
    %c31_i32_119 = arith.constant 31 : i32
    %189 = tpu.dynamic_rotate %105 by %c31_i32_119 dim 0 : vector<32x256xf32>, i32 -> vector<32x256xf32>
    %c0_120 = arith.constant 0 : index
    %c0_121 = arith.constant 0 : index
    %c0_122 = arith.constant 0 : index
    %190 = vector.load %arg4[%c0_120, %c0_121, %c0_122] : memref<2x32x1xf32, #tpu.memory_space<vmem>>, vector<1x32x1xf32>
    %191 = vector.shape_cast %190 : vector<1x32x1xf32> to vector<32x1xf32>
    %192 = vector.broadcast %191 : vector<32x1xf32> to vector<32x256xf32>
    %193 = arith.mulf %189, %192 : vector<32x256xf32>
    %194 = arith.addf %188, %193 : vector<32x256xf32>
    %c1_i32_123 = arith.constant 1 : i32
    %195 = tpu.dynamic_rotate %105 by %c1_i32_123 dim 0 : vector<32x256xf32>, i32 -> vector<32x256xf32>
    %c1_124 = arith.constant 1 : index
    %c0_125 = arith.constant 0 : index
    %c0_126 = arith.constant 0 : index
    %196 = vector.load %arg4[%c1_124, %c0_125, %c0_126] : memref<2x32x1xf32, #tpu.memory_space<vmem>>, vector<1x32x1xf32>
    %197 = vector.shape_cast %196 : vector<1x32x1xf32> to vector<32x1xf32>
    %198 = vector.broadcast %197 : vector<32x1xf32> to vector<32x256xf32>
    %199 = arith.mulf %195, %198 : vector<32x256xf32>
    %200 = arith.addf %178, %199 : vector<32x256xf32>
    %201 = arith.addf %200, %194 : vector<32x256xf32>
    %202 = vector.broadcast %0 : vector<32x1xf32> to vector<32x256xf32>
    %203 = arith.addf %201, %202 : vector<32x256xf32>
    %c1_127 = arith.constant 1 : index
    %c0_128 = arith.constant 0 : index
    %c0_129 = arith.constant 0 : index
    %204 = vector.load %arg6[%c1_127, %c0_128, %c0_129] : memref<2x32x256xf32, #tpu.memory_space<vmem>>, vector<1x32x256xf32>
    %205 = vector.shape_cast %204 : vector<1x32x256xf32> to vector<32x256xf32>
    %206 = vector.shape_cast %203 : vector<32x256xf32> to vector<1x32x256xf32>
    tpu.vector_store %arg6[%c1_127, %c0_128, %c0_129], %206 {strides = array<i32>} : memref<2x32x256xf32, #tpu.memory_space<vmem>>, vector<1x32x256xf32>,
    return
  }
  func.func @transform_0(%arg0: i32) -> (i32, i32, i32) {
    %c0_i32 = arith.constant 0 : i32
    %c0_i32_0 = arith.constant 0 : i32
    %c0_i32_1 = arith.constant 0 : i32
    return %arg0, %c0_i32, %c0_i32_0 : i32, i32, i32
  }
  func.func @transform_1(%arg0: i32) -> (i32, i32, i32) {
    %c0_i32 = arith.constant 0 : i32
    %c0_i32_0 = arith.constant 0 : i32
    %c0_i32_1 = arith.constant 0 : i32
    %c0_i32_2 = arith.constant 0 : i32
    return %c0_i32, %c0_i32_0, %c0_i32_1 : i32, i32, i32
  }
  func.func @transform_2(%arg0: i32) -> (i32, i32, i32) {
    %c0_i32 = arith.constant 0 : i32
    %c0_i32_0 = arith.constant 0 : i32
    %c0_i32_1 = arith.constant 0 : i32
    %c0_i32_2 = arith.constant 0 : i32
    return %c0_i32, %c0_i32_0, %c0_i32_1 : i32, i32, i32
  }
  func.func @transform_3(%arg0: i32) -> (i32, i32, i32) {
    %c0_i32 = arith.constant 0 : i32
    %c0_i32_0 = arith.constant 0 : i32
    %c0_i32_1 = arith.constant 0 : i32
    %c0_i32_2 = arith.constant 0 : i32
    return %c0_i32, %c0_i32_0, %c0_i32_1 : i32, i32, i32
  }
  func.func @transform_4(%arg0: i32) -> (i32, i32) {
    %c0_i32 = arith.constant 0 : i32
    %c0_i32_0 = arith.constant 0 : i32
    %c0_i32_1 = arith.constant 0 : i32
    return %c0_i32, %c0_i32_0 : i32, i32
  }
  func.func @transform_5(%arg0: i32) -> (i32, i32, i32) {
    %c0_i32 = arith.constant 0 : i32
    %c0_i32_0 = arith.constant 0 : i32
    %c0_i32_1 = arith.constant 0 : i32
    return %arg0, %c0_i32, %c0_i32_0 : i32, i32, i32
  }
}

</mosaic_0001>

<bundles_post_ra>
// kernel: tpu_custom_call.1
= control target key start
LH: loop header
LB: loop body
LE: loop exit
PB: predicated region body
PF: predicated region fallthrough
CT: control target
= control target key end

     0   :  { %10 = vsyncpa [#allocation3], 0  ;;  %s4472_s0 = inlined_call_operand.vmem [shape: f32[4,32,256], index: 0, kind: input, shape index: {}]   ;;  %s4473_s1 = inlined_call_operand.vmem [shape: f32[9,32,1], index: 1, kind: input, shape index: {}]   ;;  %s4474_s2 = inlined_call_operand.vmem [shape: f32[9,1,256], index: 2, kind: input, shape index: {}]   ;;  %s4475_s3 = inlined_call_operand.vmem [shape: f32[2,32,1], index: 3, kind: input, shape index: {}]   ;;  %s4476_s4 = inlined_call_operand.vmem [shape: f32[32,1], index: 4, kind: input, shape index: {}]   ;;  %s4477_s5 = inlined_call_operand.hbm [shape: f32[4,32,256], index: 5, kind: output, shape index: {}]  }
   0x1   :  { %12 = vsyncpa [#allocation3 + $0x1], 0  ;;  %s2325_s18 = smov 0   ;;  %s2327_s19 = smov 0  }
   0x2   :  { %s2329_s20 = smov 0   ;;  %s2331_s21 = smov 0  }
   0x3 LB: > { %s2346_s22 = sadd.s32 4294967295, %s2282_s21   ;;  %s2042_s23 = sadd.s32 4294967294, %s2282_s21   ;;  %s2282_s21 = sphi %s2331_s21, %s4792_s21   ;;  %s2278_s20 = sphi %s2329_s20, %s4791_s20   ;;  %s2274_s19 = sphi %s2327_s19, %s4790_s19   ;;  %s2270_s18 = sphi %s2325_s18, %s4789_s18  }
   0x4   : > { %s2350_s24 = sadd.s32 1, %s2282_s21   ;;  %s135_s25 = sadd.s32 1, %s2278_s20 }
   0x5   : > { %s132_s26 = ssub.s32 %s2282_s21, %s2350_s24  ;;  %p145_p0 = scmp.ne.s32.totalorder %s2278_s20, %s2274_s19 }
   0x6   : > { %p133_p1 = scmp.eq.s32.totalorder %s132_s26, 0  ;;  %p146_p2 = scmp.eq.s32.totalorder %s2346_s22, 1 }
   0x7   : > { %p151_p3 = scmp.ne.s32.totalorder %s2274_s19, %s2270_s18  ;;  %p152_p4 = scmp.eq.s32.totalorder %s2042_s23, 1 }
   0x8   : > { %s2361_s27 = scalar_select %p133_p1, %s2278_s20, %s135_s25  }
   0x9   : > { %p2363_p5 = por %p146_p2, %p145_p0  ;;  %p2367_p6 = por %p152_p4, %p151_p3 }
   0xa   : > { %p2045_p7 = scmp.ge.s32.totalorder %s2282_s21, 1  ;;  %p192_p8 = scmp.lt.s32.totalorder %s2282_s21, 3 }
   0xc   : > { %p193_p9 = pnand %p2045_p7, %p192_p8 }
   0xe   : > { %196 = sbr.rel (%p193_p9) target bundleno = 620 (0x26c), region = 40 }
  0x15   : > { %v2376_v0 = vld [vmem:[%s4473_s1 + $0x90] sm:$0xff]  ;;  %v2381_v1 = vld [vmem:[%s4473_s1 + $0x80] sm:$0xff]  ;;  %s2047_s9 = sshll.u32 %s2346_s22, 1  ;;  %v2284_v2 = vmov 0   ;;  %v2389_v3 = vld [vmem:[%s4473_s1 + $0x98] sm:$0xff]  ;;  %s2285_s23 = smov 17  }
  0x16   : > { %2211 = vset.pattern.permute.xlu1 %v2284_v2  ;;  %2210 = vset.pattern.permute.xlu0 %v2284_v2  ;;  %p222_p10 = scmp.lt.s32.totalorder %s2047_s9, 3  ;;  %v2394_v4 = vld [vmem:[%s4473_s1 + $0x88] sm:$0xff]  ;;  %v2451_v14 = vld [vmem:[%s4473_s1] sm:$0xff]  ;;  %v2458_v15 = vld [vmem:[%s4473_s1 + $0x18] sm:$0xff]  ;;  %s2286_s11 = smov 16  }
  0x17   : > { %258 = vperm.xlu1 %2211, %v2376_v0   ;;  %248 = vperm.xlu0 %2210, %v2381_v1   ;;  %v2446_v13 = vld [vmem:[%s4473_s1 + $0x8] sm:$0xff]  ;;  %v2463_v16 = vld [vmem:[%s4473_s1 + $0x10] sm:$0xff]  ;;  %v2491_v18 = vld [vmem:[%s4473_s1 + $0x20] sm:$0xff]  ;;  %s2287_s6 = smov 15   ;;  %s2288_s16 = smov 1  }
  0x18   : > { %s4794_s9 = smov (!%p222_p10, %s2047_s9), 3  ;;  %v2486_v17 = vld [vmem:[%s4473_s1 + $0x28] sm:$0xff]  ;;  %v2498_v19 = vld [vmem:[%s4473_s1 + $0x38] sm:$0xff]  ;;  %v2503_v20 = vld [vmem:[%s4473_s1 + $0x30] sm:$0xff]  ;;  %s2289_s13 = smov 127  }
  0x19   : > { %s2158_s14 = sshll.u32 %s4794_s9, 6  ;;  %v2526_v21 = vld [vmem:[%s4473_s1 + $0x48] sm:$0xff]  ;;  %v2531_v22 = vld [vmem:[%s4473_s1 + $0x40] sm:$0xff]  ;;  %v2538_v23 = vld [vmem:[%s4473_s1 + $0x58] sm:$0xff]  ;;  %s2290_s10 = smov 113  }
  0x1a   : > { %s2401_s17 = scalar_lea.vmem %s4472_s0, %s2158_s14  ;;  %4578 = vst [vmem:[#allocation6_spill] sm:$0xff] %v2526_v21  ;;  %4579 = vst [vmem:[#allocation7_spill] sm:$0xff] %v2531_v22  ;;  %v2543_v24 = vld [vmem:[%s4473_s1 + $0x50] sm:$0xff]  ;;  %v2065_v25 = vld [vmem:[%s4473_s1 + $0x68] sm:$0xff]  ;;  %s2291_s9 = smov 112  }
  0x1b   : > { %263 = vperm.xlu1 %2211, %v2389_v3   ;;  %253 = vperm.xlu0 %2210, %v2394_v4   ;;  %v2404_v5 = vld [vmem:[%s2401_s17 + $0x10] sm:$0xff]  ;;  %v2407_v6 = vld [vmem:[%s2401_s17] sm:$0xff]  ;;  %v2424_v9 = vld [vmem:[%s2401_s17 + $0x18] sm:$0xff]  ;;  %4580 = vst [vmem:[#allocation8_spill] sm:$0xff] %v2538_v23  ;;  %s4478_s12 = smov 111   ;;  %s218_s26 = sand.u32 1, %s2274_s19  }
  0x1c   : > { %v2414_v7 = vld [vmem:[%s2401_s17 + $0x30] sm:$0xff]  ;;  %v2417_v8 = vld [vmem:[%s2401_s17 + $0x20] sm:$0xff]  ;;  %v2427_v10 = vld [vmem:[%s2401_s17 + $0x8] sm:$0xff]  ;;  %4581 = vst [vmem:[#allocation9_spill] sm:$0xff] %v2543_v24  ;;  %s2293_s15 = smov [#allocation2]  }
  0x1d   : > { %v2434_v11 = vld [vmem:[%s2401_s17 + $0x38] sm:$0xff]  ;;  %v2437_v12 = vld [vmem:[%s2401_s17 + $0x28] sm:$0xff]  ;;  %v2064_v26 = vld [vmem:[%s4473_s1 + $0x60] sm:$0xff] }
  0x1e   : > { %4577 = vst [vmem:[#allocation5_spill] sm:$0xff] %v2434_v11  ;;  %v2067_v27 = vld [vmem:[%s4473_s1 + $0x78] sm:$0xff]  ;;  %v2066_v28 = vld [vmem:[%s4473_s1 + $0x70] sm:$0xff]  ;;  %v2070_v29 = vld [vmem:[%s4473_s1 + $0xa8] sm:$0xff] }
  0x1f   : > { %276 = vrot.lane.b32.xlu1 %v2404_v5, %s2285_s23  ;;  %274 = vrot.lane.b32.xlu0 %v2407_v6, %s2285_s23  ;;  %v2069_v30 = vld [vmem:[%s4473_s1 + $0xa0] sm:$0xff]  ;;  %v2072_v31 = vld [vmem:[%s4473_s1 + $0xb8] sm:$0xff] }
  0x20   : > { %v2071_v32 = vld [vmem:[%s4473_s1 + $0xb0] sm:$0xff]  ;;  %v2075_v41 = vld [vmem:[%s4473_s1 + $0xc8] sm:$0xff]  ;;  %v2074_v42 = vld [vmem:[%s4473_s1 + $0xc0] sm:$0xff] }
  0x21   : > { %v2077_v45 = vld [vmem:[%s4473_s1 + $0xd8] sm:$0xff]  ;;  %v2076_v46 = vld [vmem:[%s4473_s1 + $0xd0] sm:$0xff]  ;;  %v2080_v57 = vld [vmem:[%s4473_s1 + $0xe8] sm:$0xff] }
  0x22   : > { %v2079_v58 = vld [vmem:[%s4473_s1 + $0xe0] sm:$0xff]  ;;  %v2082_v61 = vld [vmem:[%s4473_s1 + $0xf8] sm:$0xff]  ;;  %v2081_v62 = vld [vmem:[%s4473_s1 + $0xf0] sm:$0xff] }
  0x23   : > { %280 = vrot.lane.b32.xlu1 %v2414_v7, %s2285_s23  ;;  %278 = vrot.lane.b32.xlu0 %v2417_v8, %s2285_s23 }
  0x27   : > { %284 = vrot.lane.b32.xlu1 %v2424_v9, %s2285_s23  ;;  %282 = vrot.lane.b32.xlu0 %v2427_v10, %s2285_s23 }
  0x2b   : > { %288 = vrot.lane.b32.xlu1 %v2434_v11, %s2285_s23  ;;  %286 = vrot.lane.b32.xlu0 %v2437_v12, %s2285_s23 }
  0x2f   : > { %312 = vperm.xlu1 %2211, %v2446_v13   ;;  %307 = vperm.xlu0 %2210, %v2451_v14  }
  0x33   : > { %322 = vperm.xlu1 %2211, %v2458_v15   ;;  %317 = vperm.xlu0 %2210, %v2463_v16  }
  0x37   : > { %363 = vrot.lane.b32.xlu1 %v2404_v5, %s2286_s11  ;;  %361 = vrot.lane.b32.xlu0 %v2407_v6, %s2286_s11 }
  0x3b   : > { %367 = vrot.lane.b32.xlu1 %v2414_v7, %s2286_s11  ;;  %365 = vrot.lane.b32.xlu0 %v2417_v8, %s2286_s11 }
  0x3f   : > { %371 = vrot.lane.b32.xlu1 %v2424_v9, %s2286_s11  ;;  %369 = vrot.lane.b32.xlu0 %v2427_v10, %s2286_s11 }
  0x43   : > { %375 = vrot.lane.b32.xlu1 %v2434_v11, %s2286_s11  ;;  %373 = vrot.lane.b32.xlu0 %v2437_v12, %s2286_s11 }
  0x47   : > { %398 = vperm.xlu1 %2211, %v2486_v17   ;;  %393 = vperm.xlu0 %2210, %v2491_v18  }
  0x4b   : > { %408 = vperm.xlu1 %2211, %v2498_v19   ;;  %403 = vperm.xlu0 %2210, %v2503_v20  }
  0x4f   : > { %442 = vrot.lane.b32.xlu1 %v2404_v5, %s2287_s6  ;;  %440 = vrot.lane.b32.xlu0 %v2407_v6, %s2287_s6 }
  0x53   : > { %446 = vrot.lane.b32.xlu1 %v2414_v7, %s2287_s6  ;;  %444 = vrot.lane.b32.xlu0 %v2417_v8, %s2287_s6 }
  0x57   : > { %450 = vrot.lane.b32.xlu1 %v2424_v9, %s2287_s6  ;;  %448 = vrot.lane.b32.xlu0 %v2427_v10, %s2287_s6 }
  0x5b   : > { %454 = vrot.lane.b32.xlu1 %v2434_v11, %s2287_s6  ;;  %452 = vrot.lane.b32.xlu0 %v2437_v12, %s2287_s6 }
  0x5f   : > { %477 = vperm.xlu1 %2211, %v2526_v21   ;;  %472 = vperm.xlu0 %2210, %v2531_v22   ;;  %v984_v22 = vld [vmem:[%s4475_s3 + $0x18] sm:$0xff] }
  0x63   : > { %487 = vperm.xlu1 %2211, %v2538_v23   ;;  %482 = vperm.xlu0 %2210, %v2543_v24   ;;  %v982_v24 = vld [vmem:[%s4475_s3 + $0x8] sm:$0xff] }
  0x67   : > { %529 = vrot.lane.b32.xlu1 %v2404_v5, %s2288_s16  ;;  %527 = vrot.lane.b32.xlu0 %v2407_v6, %s2288_s16 }
  0x6b   : > { %533 = vrot.lane.b32.xlu1 %v2414_v7, %s2288_s16  ;;  %531 = vrot.lane.b32.xlu0 %v2417_v8, %s2288_s16 }
  0x6f   : > { %537 = vrot.lane.b32.xlu1 %v2424_v9, %s2288_s16  ;;  %535 = vrot.lane.b32.xlu0 %v2427_v10, %s2288_s16 }
  0x73   : > { %541 = vrot.lane.b32.xlu1 %v2434_v11, %s2288_s16  ;;  %539 = vrot.lane.b32.xlu0 %v2437_v12, %s2288_s16 }
  0x77   : > { %564 = vperm.xlu1 %2211, %v2065_v25   ;;  %559 = vperm.xlu0 %2210, %v2064_v26  }
  0x7b   : > { %574 = vperm.xlu1 %2211, %v2067_v27   ;;  %569 = vperm.xlu0 %2210, %v2066_v28  }
  0x7f   : > { %616 = vrot.lane.b32.xlu1 %v2404_v5, %s2289_s13  ;;  %614 = vrot.lane.b32.xlu0 %v2407_v6, %s2289_s13 }
  0x83   : > { %620 = vrot.lane.b32.xlu1 %v2414_v7, %s2289_s13  ;;  %618 = vrot.lane.b32.xlu0 %v2417_v8, %s2289_s13 }
  0x87   : > { %624 = vrot.lane.b32.xlu1 %v2424_v9, %s2289_s13  ;;  %622 = vrot.lane.b32.xlu0 %v2427_v10, %s2289_s13 }
  0x8b   : > { %628 = vrot.lane.b32.xlu1 %v2434_v11, %s2289_s13  ;;  %626 = vrot.lane.b32.xlu0 %v2437_v12, %s2289_s13 }
  0x8f   : > { %651 = vperm.xlu1 %2211, %v2070_v29   ;;  %646 = vperm.xlu0 %2210, %v2069_v30  }
  0x93   : > { %661 = vperm.xlu1 %2211, %v2072_v31   ;;  %656 = vperm.xlu0 %2210, %v2071_v32  }
  0x96   : > { %v2603_v33 = vpop.permute.xlu1 %258  ;;  %v2605_v34 = vpop.permute.xlu0 %248 }
  0x97   : > { %703 = vrot.lane.b32.xlu1 %v2404_v5, %s2290_s10  ;;  %701 = vrot.lane.b32.xlu0 %v2407_v6, %s2290_s10 }
  0x9a   : > { %v2611_v35 = vpop.permute.xlu1 %263  ;;  %v2613_v36 = vpop.permute.xlu0 %253 }
  0x9b   : > { %707 = vrot.lane.b32.xlu1 %v2414_v7, %s2290_s10  ;;  %705 = vrot.lane.b32.xlu0 %v2417_v8, %s2290_s10 }
  0x9e   : > { %v2619_v37 = vpop.permute.xlu1 %276  ;;  %v2621_v38 = vpop.permute.xlu0 %274 }
  0x9f   : > { %711 = vrot.lane.b32.xlu1 %v2424_v9, %s2290_s10  ;;  %709 = vrot.lane.b32.xlu0 %v2427_v10, %s2290_s10 }
  0xa2   : > { %v2627_v39 = vpop.permute.xlu1 %280  ;;  %v2629_v40 = vpop.permute.xlu0 %278 }
  0xa3   : > { %715 = vrot.lane.b32.xlu1 %v2434_v11, %s2290_s10  ;;  %713 = vrot.lane.b32.xlu0 %v2437_v12, %s2290_s10 }
  0xa6   : > { %v2641_v43 = vpop.permute.xlu1 %284  ;;  %v2643_v44 = vpop.permute.xlu0 %282 }
  0xa7   : > { %738 = vperm.xlu1 %2211, %v2075_v41   ;;  %733 = vperm.xlu0 %2210, %v2074_v42   ;;  %v2085_v41 = vld [vmem:[%s4473_s1 + $0x108] sm:$0xff]  ;;  %v2084_v42 = vld [vmem:[%s4473_s1 + $0x100] sm:$0xff] }
  0xaa   : > { %v2651_v47 = vpop.permute.xlu1 %288  ;;  %v2653_v48 = vpop.permute.xlu0 %286 }
  0xab   : > { %748 = vperm.xlu1 %2211, %v2077_v45   ;;  %743 = vperm.xlu0 %2210, %v2076_v46  }
  0xae   : > { %v2655_v49 = vpop.permute.xlu1 %312  ;;  %v2657_v50 = vpop.permute.xlu0 %307 }
  0xaf   : > { %790 = vrot.lane.b32.xlu1 %v2404_v5, %s2291_s9  ;;  %788 = vrot.lane.b32.xlu0 %v2407_v6, %s2291_s9 }
  0xb2   : > { %v2663_v51 = vpop.permute.xlu1 %322  ;;  %v2665_v52 = vpop.permute.xlu0 %317 }
  0xb3   : > { %794 = vrot.lane.b32.xlu1 %v2414_v7, %s2291_s9  ;;  %792 = vrot.lane.b32.xlu0 %v2417_v8, %s2291_s9 }
  0xb6   : > { %v2671_v53 = vpop.permute.xlu1 %363  ;;  %v2673_v54 = vpop.permute.xlu0 %361 }
  0xb7   : > { %798 = vrot.lane.b32.xlu1 %v2424_v9, %s2291_s9  ;;  %796 = vrot.lane.b32.xlu0 %v2427_v10, %s2291_s9 }
  0xba   : > { %v2679_v55 = vpop.permute.xlu1 %367  ;;  %v2681_v56 = vpop.permute.xlu0 %365 }
  0xbb   : > { %802 = vrot.lane.b32.xlu1 %v2434_v11, %s2291_s9  ;;  %800 = vrot.lane.b32.xlu0 %v2437_v12, %s2291_s9 }
  0xbe   : > { %v2693_v59 = vpop.permute.xlu1 %371  ;;  %v2695_v60 = vpop.permute.xlu0 %369 }
  0xbf   : > { %825 = vperm.xlu1 %2211, %v2080_v57   ;;  %820 = vperm.xlu0 %2210, %v2079_v58   ;;  %v2087_v57 = vld [vmem:[%s4473_s1 + $0x118] sm:$0xff]  ;;  %v2086_v58 = vld [vmem:[%s4473_s1 + $0x110] sm:$0xff] }
  0xc2   : > { %v2703_v63 = vpop.permute.xlu1 %375  ;;  %v2705_v2 = vpop.permute.xlu0 %373 }
  0xc3   : > { %835 = vperm.xlu1 %2211, %v2082_v61   ;;  %830 = vperm.xlu0 %2210, %v2081_v62  }
  0xc6   : > { %v2707_v25 = vpop.permute.xlu1 %398  ;;  %v2709_v26 = vpop.permute.xlu0 %393 }
  0xc7   : > { %877 = vrot.lane.b32.xlu1 %v2404_v5, %s4478_s12  ;;  %875 = vrot.lane.b32.xlu0 %v2407_v6, %s4478_s12 }
  0xca   : > { %v2715_v27 = vpop.permute.xlu1 %408  ;;  %v2717_v28 = vpop.permute.xlu0 %403 }
  0xcb   : > { %881 = vrot.lane.b32.xlu1 %v2414_v7, %s4478_s12  ;;  %879 = vrot.lane.b32.xlu0 %v2417_v8, %s4478_s12 }
  0xce   : > { %v2723_v29 = vpop.permute.xlu1 %442  ;;  %v2725_v30 = vpop.permute.xlu0 %440 }
  0xcf   : > { %4582 = vst [vmem:[#allocation10_spill] sm:$0xff] %v2725_v30  ;;  %885 = vrot.lane.b32.xlu1 %v2424_v9, %s4478_s12  ;;  %883 = vrot.lane.b32.xlu0 %v2427_v10, %s4478_s12 }
  0xd2   : > { %v2731_v31 = vpop.permute.xlu1 %446  ;;  %v2733_v32 = vpop.permute.xlu0 %444 }
  0xd3   : > { %4583 = vst [vmem:[#allocation11_spill] sm:$0xff] %v2731_v31  ;;  %4584 = vst [vmem:[#allocation12_spill] sm:$0xff] %v2733_v32  ;;  %889 = vrot.lane.b32.xlu1 %v2434_v11, %s4478_s12  ;;  %887 = vrot.lane.b32.xlu0 %v2437_v12, %s4478_s12  ;;  %v2090_v32 = vld [vmem:[%s4475_s3 + $0x28] sm:$0xff]  ;;  %v290_v31 = vlaneseq  ;;  %s3754_s12 = sshll.u32 %s218_s26, 7 }
  0xd6   : > { %v2745_v45 = vpop.permute.xlu1 %450  ;;  %v2747_v46 = vpop.permute.xlu0 %448 }
  0xd7   : > { %4585 = vst [vmem:[#allocation13_spill] sm:$0xff] %v2747_v46  ;;  %912 = vperm.xlu1 %2211, %v2085_v41   ;;  %907 = vperm.xlu0 %2210, %v2084_v42   ;;  %v981_v41 = vld [vmem:[%s4475_s3] sm:$0xff] }
  0xda   : > { %v2755_v61 = vpop.permute.xlu1 %454  ;;  %v2757_v62 = vpop.permute.xlu0 %452 }
  0xdb   : > { %4586 = vst [vmem:[#allocation14_spill] sm:$0xff] %v2755_v61  ;;  %4587 = vst [vmem:[#allocation15_spill] sm:$0xff] %v2757_v62  ;;  %922 = vperm.xlu1 %2211, %v2087_v57   ;;  %917 = vperm.xlu0 %2210, %v2086_v58   ;;  %v983_v57 = vld [vmem:[%s4475_s3 + $0x10] sm:$0xff]  ;;  %v2893_v61 = vshrl.u32 %v290_v31, 7 }
  0xdd   : > { %4620 = vst [vmem:[#allocation48_spill] sm:$0xff] %v2893_v61 }
  0xde   : > { %v2765_v42 = vpop.permute.xlu1 %477  ;;  %v2767_v23 = vpop.permute.xlu0 %472 }
  0xdf   : > { %4588 = vst [vmem:[#allocation16_spill] sm:$0xff] %v2765_v42  ;;  %4589 = vst [vmem:[#allocation17_spill] sm:$0xff] %v2767_v23  ;;  %992 = vperm.xlu1 %2211, %v982_v24   ;;  %987 = vperm.xlu0 %2210, %v981_v41   ;;  %v2089_v24 = vld [vmem:[%s4475_s3 + $0x20] sm:$0xff]  ;;  %v2900_v23 = vand.u32 127, %v290_v31 }
  0xe1   : > { %vm292_vm0 = vcmp.lt.s32.totalorder %v2900_v23, 17  ;;  %vm377_vm1 = vcmp.lt.s32.totalorder %v2900_v23, 16  ;;  %vm456_vm2 = vcmp.lt.s32.totalorder %v2900_v23, 15  ;;  %vm543_vm3 = vcmp.lt.s32.totalorder %v2900_v23, 1 }
  0xe2   : > { %v2775_v58 = vpop.permute.xlu1 %487  ;;  %v2777_v21 = vpop.permute.xlu0 %482  ;;  %vm630_vm6 = vcmp.lt.s32.totalorder %v2900_v23, 127  ;;  %vm717_vm7 = vcmp.lt.s32.totalorder %v2900_v23, 113  ;;  %vm804_vm8 = vcmp.lt.s32.totalorder %v2900_v23, 112  ;;  %vm891_vm9 = vcmp.lt.s32.totalorder %v2900_v23, 111 }
  0xe3   : > { %4590 = vst [vmem:[#allocation18_spill] sm:$0xff] %v2775_v58  ;;  %4591 = vst [vmem:[#allocation19_spill] sm:$0xff] %v2777_v21  ;;  %1002 = vperm.xlu1 %2211, %v984_v22   ;;  %997 = vperm.xlu0 %2210, %v983_v57   ;;  %v2092_v21 = vld [vmem:[%s4475_s3 + $0x38] sm:$0xff]  ;;  %v2091_v22 = vld [vmem:[%s4475_s3 + $0x30] sm:$0xff] }
  0xe6   : > { %v2785_v41 = vpop.permute.xlu1 %529  ;;  %v2787_v62 = vpop.permute.xlu0 %527 }
  0xe7   : > { %4592 = vst [vmem:[#allocation20_spill] sm:$0xff] %v2785_v41  ;;  %4593 = vst [vmem:[#allocation21_spill] sm:$0xff] %v2787_v62  ;;  %1050 = vperm.xlu1 %2211, %v2090_v32   ;;  %1045 = vperm.xlu0 %2210, %v2089_v24   ;;  %v230_v62 = vld [vmem:[%s4476_s4 + $0x8] sm:$0xff]  ;;  %v229_v32 = vld [vmem:[%s4476_s4] sm:$0xff] }
  0xea   : > { %v2795_v57 = vpop.permute.xlu1 %533  ;;  %v2797_v58 = vpop.permute.xlu0 %531 }
  0xeb   : > { %4594 = vst [vmem:[#allocation22_spill] sm:$0xff] %v2795_v57  ;;  %4595 = vst [vmem:[#allocation23_spill] sm:$0xff] %v2797_v58  ;;  %1060 = vperm.xlu1 %2211, %v2092_v21   ;;  %1055 = vperm.xlu0 %2210, %v2091_v22   ;;  %v232_v21 = vld [vmem:[%s4476_s4 + $0x18] sm:$0xff]  ;;  %v231_v22 = vld [vmem:[%s4476_s4 + $0x10] sm:$0xff] }
  0xee   : > { %v2805_v24 = vpop.permute.xlu1 %537  ;;  %v2807_v41 = vpop.permute.xlu0 %535 }
  0xef   : > { %4596 = vst [vmem:[#allocation24_spill] sm:$0xff] %v2805_v24  ;;  %4597 = vst [vmem:[#allocation25_spill] sm:$0xff] %v2807_v41  ;;  %1094 = vperm.xlu1 %2211, %v230_v62   ;;  %1089 = vperm.xlu0 %2210, %v229_v32  }
  0xf2   : > { %v2815_v58 = vpop.permute.xlu1 %541  ;;  %v2817_v57 = vpop.permute.xlu0 %539 }
  0xf3   : > { %4598 = vst [vmem:[#allocation26_spill] sm:$0xff] %v2815_v58  ;;  %4599 = vst [vmem:[#allocation27_spill] sm:$0xff] %v2817_v57  ;;  %1104 = vperm.xlu1 %2211, %v232_v21   ;;  %1099 = vperm.xlu0 %2210, %v231_v22   ;;  %v2832_v21 = vld [vmem:[%s2401_s17 + $0x50] sm:$0xff]  ;;  %v2835_v22 = vld [vmem:[%s2401_s17 + $0x40] sm:$0xff] }
  0xf4   : > { %4604 = vst [vmem:[#allocation32_spill] sm:$0xff] %v2832_v21  ;;  %4605 = vst [vmem:[#allocation33_spill] sm:$0xff] %v2835_v22 }
  0xf6   : > { %v2819_v62 = vpop.permute.xlu1 %564  ;;  %v2821_v32 = vpop.permute.xlu0 %559 }
  0xf7   : > { %4600 = vst [vmem:[#allocation28_spill] sm:$0xff] %v2819_v62  ;;  %4601 = vst [vmem:[#allocation29_spill] sm:$0xff] %v2821_v32  ;;  %1143 = vperm.xlu1 %2211, %v2394_v4   ;;  %1138 = vperm.xlu0 %2210, %v2381_v1   ;;  %v2846_v1 = vld [vmem:[%s2401_s17 + $0x70] sm:$0xff] }
  0xf8   : > { %4608 = vst [vmem:[#allocation36_spill] sm:$0xff] %v2846_v1 }
  0xfa   : > { %v2825_v41 = vpop.permute.xlu1 %574  ;;  %v2827_v24 = vpop.permute.xlu0 %569 }
  0xfb   : > { %4602 = vst [vmem:[#allocation30_spill] sm:$0xff] %v2825_v41  ;;  %4603 = vst [vmem:[#allocation31_spill] sm:$0xff] %v2827_v24  ;;  %1153 = vperm.xlu1 %2211, %v2389_v3   ;;  %1148 = vperm.xlu0 %2210, %v2376_v0   ;;  %v2849_v3 = vld [vmem:[%s2401_s17 + $0x60] sm:$0xff] }
  0xfc   : > { %4609 = vst [vmem:[#allocation37_spill] sm:$0xff] %v2849_v3 }
  0xfe   : > { %v2837_v57 = vpop.permute.xlu1 %616  ;;  %v2839_v4 = vpop.permute.xlu0 %614 }
  0xff   : > { %4606 = vst [vmem:[#allocation34_spill] sm:$0xff] %v2837_v57  ;;  %4607 = vst [vmem:[#allocation35_spill] sm:$0xff] %v2839_v4  ;;  %1166 = vrot.lane.b32.xlu1 %v2832_v21, %s2285_s23  ;;  %1164 = vrot.lane.b32.xlu0 %v2835_v22, %s2285_s23  ;;  %v2860_v4 = vld [vmem:[%s2401_s17 + $0x58] sm:$0xff]  ;;  %v2863_v57 = vld [vmem:[%s2401_s17 + $0x48] sm:$0xff] }
 0x100   : > { %4612 = vst [vmem:[#allocation40_spill] sm:$0xff] %v2860_v4  ;;  %4613 = vst [vmem:[#allocation41_spill] sm:$0xff] %v2863_v57 }
 0x102   : > { %v2851_v0 = vpop.permute.xlu1 %620  ;;  %v2853_v24 = vpop.permute.xlu0 %618 }
 0x103   : > { %4610 = vst [vmem:[#allocation38_spill] sm:$0xff] %v2851_v0  ;;  %4611 = vst [vmem:[#allocation39_spill] sm:$0xff] %v2853_v24  ;;  %1170 = vrot.lane.b32.xlu1 %v2846_v1, %s2285_s23  ;;  %1168 = vrot.lane.b32.xlu0 %v2849_v3, %s2285_s23  ;;  %v2874_v24 = vld [vmem:[%s2401_s17 + $0x78] sm:$0xff]  ;;  %v2877_v0 = vld [vmem:[%s2401_s17 + $0x68] sm:$0xff] }
 0x106   : > { %v2865_v41 = vpop.permute.xlu1 %624  ;;  %v2867_v58 = vpop.permute.xlu0 %622 }
 0x107   : > { %4614 = vst [vmem:[#allocation42_spill] sm:$0xff] %v2865_v41  ;;  %4615 = vst [vmem:[#allocation43_spill] sm:$0xff] %v2867_v58  ;;  %1174 = vrot.lane.b32.xlu1 %v2860_v4, %s2285_s23  ;;  %1172 = vrot.lane.b32.xlu0 %v2863_v57, %s2285_s23 }
 0x10a   : > { %v2879_v32 = vpop.permute.xlu1 %628  ;;  %v2881_v62 = vpop.permute.xlu0 %626 }
 0x10b   : > { %4616 = vst [vmem:[#allocation44_spill] sm:$0xff] %v2879_v32  ;;  %4617 = vst [vmem:[#allocation45_spill] sm:$0xff] %v2881_v62  ;;  %1178 = vrot.lane.b32.xlu1 %v2874_v24, %s2285_s23  ;;  %1176 = vrot.lane.b32.xlu0 %v2877_v0, %s2285_s23  ;;  %s3780_s23 = scalar_lea.vmem [#allocation2], %s3754_s12 }
 0x10c   : > { %s1980_s8 = sshll.u32 %s3780_s23, 4  ;;  %s4424_s8 = int_to_ptr.vmem [resolvable:$true] %s1980_s8 }
 0x10d   : > { %s2220_s14 = scalar_lea.vmem %s4424_s8, 2048 }
 0x10e   : > { %v2887_v58 = vpop.permute.xlu1 %651  ;;  %v2889_v41 = vpop.permute.xlu0 %646  ;;  %p2221_p11 = scmp.ne.s32.totalorder %s4424_s8, %s2220_s14 }
 0x10f   : > { %4618 = vst [vmem:[#allocation46_spill] sm:$0xff] %v2887_v58  ;;  %4619 = vst [vmem:[#allocation47_spill] sm:$0xff] %v2889_v41  ;;  %1199 = vperm.xlu1 %2211, %v2446_v13   ;;  %1194 = vperm.xlu0 %2210, %v2451_v14   ;;  %v2904_v58 = vsub.s32 0, %v2893_v61  ;;  %v2907_v13 = vsub.s32 1, %v2893_v61 }
 0x110   : > { %p2222_p12 = pnand %p2221_p11, %p2363_p5 }
 0x111   : > { %4623 = vst [vmem:[#allocation51_spill] sm:$0xff] %v2904_v58  ;;  %4624 = vst [vmem:[#allocation52_spill] sm:$0xff] %v2907_v13 }
 0x112   : > { %v2895_v32 = vpop.permute.xlu1 %661  ;;  %v2897_v62 = vpop.permute.xlu0 %656  ;;  %p2223_p13 = pneg %p2222_p12 }
 0x113   : > { %4621 = vst [vmem:[#allocation49_spill] sm:$0xff] %v2895_v32  ;;  %4622 = vst [vmem:[#allocation50_spill] sm:$0xff] %v2897_v62  ;;  %1209 = vperm.xlu1 %2211, %v2458_v15   ;;  %1204 = vperm.xlu0 %2210, %v2463_v16   ;;  %v333_v62 = vld [vmem:[%s4474_s2] sm:$0x3]  ;;  %v2058_v15 = vld [vmem:[%s4474_s2 + $0x2] sm:$0x3] }
 0x114   : > { %v2063_v16 = vld [vmem:[%s4474_s2 + $0x4] sm:$0x3]  ;;  %v338_v31 = vrot.slane %v333_v62, %v2904_v58  ;;  %v2073_v32 = vld [vmem:[%s4474_s2 + $0xa] sm:$0x3]  ;;  %v2949_v42 = vrot.slane %v2058_v15, %v2904_v58  ;;  %v2952_v30 = vrot.slane %v2058_v15, %v2907_v13 }
 0x115   : > { %v2959_v46 = vrot.slane %v2063_v16, %v2904_v58 }
 0x116   : > { %v2909_v41 = vpop.permute.xlu1 %703  ;;  %v2911_v14 = vpop.permute.xlu0 %701 }
 0x117   : > { %4625 = vst [vmem:[#allocation53_spill] sm:$0xff] %v2909_v41  ;;  %4626 = vst [vmem:[#allocation54_spill] sm:$0xff] %v2911_v14  ;;  %1250 = vrot.lane.b32.xlu1 %v2832_v21, %s2286_s11  ;;  %1248 = vrot.lane.b32.xlu0 %v2835_v22, %s2286_s11  ;;  %v342_v14 = vrot.slane %v333_v62, %v2907_v13  ;;  %v2068_v41 = vld [vmem:[%s4474_s2 + $0x6] sm:$0x3]  ;;  %v294_v22 = vsel %vm292_vm0, %v2619_v37, %v2641_v43 }
 0x118   : > { %v298_v62 = vsel %vm292_vm0, %v2641_v43, %v2619_v37  ;;  %v2962_v37 = vrot.slane %v2063_v16, %v2907_v13  ;;  %v2967_v43 = vrot.slane %v2068_v41, %v2904_v58  ;;  %v2970_v15 = vrot.slane %v2068_v41, %v2907_v13 }
 0x119   : > { %v2984_v16 = vmul.f32 %v2603_v33, %v2437_v12  ;;  %v293_v41 = vsel %vm292_vm0, %v2621_v38, %v2643_v44 }
 0x11a   : > { %v2935_v61 = vpop.permute.xlu1 %707  ;;  %v2937_v21 = vpop.permute.xlu0 %705  ;;  %4629 = vst [vmem:[#allocation57_spill] sm:$0xff] %v2967_v43  ;;  %4630 = vst [vmem:[#allocation58_spill] sm:$0xff] %v2970_v15  ;;  %v295_v15 = vsel %vm292_vm0, %v2629_v40, %v2653_v48  ;;  %v326_v43 = vmul.f32 %v2657_v50, %v293_v41  ;;  %v268_v41 = vmul.f32 %v2613_v36, %v2404_v5 }
 0x11b   : > { %4627 = vst [vmem:[#allocation55_spill] sm:$0xff] %v2935_v61  ;;  %4628 = vst [vmem:[#allocation56_spill] sm:$0xff] %v2937_v21  ;;  %1254 = vrot.lane.b32.xlu1 %v2846_v1, %s2286_s11  ;;  %v327_v21 = vmul.f32 %v2655_v49, %v298_v62  ;;  %v328_v61 = vmul.f32 %v2655_v49, %v294_v22  ;;  %1252 = vrot.lane.b32.xlu0 %v2849_v3, %s2286_s11 }
 0x11c   : > { %v2973_v1 = vrot.slane %v2073_v32, %v2904_v58  ;;  %v2976_v49 = vrot.slane %v2073_v32, %v2907_v13  ;;  %v2980_v22 = vmul.f32 %v2603_v33, %v2417_v8  ;;  %v297_v62 = vsel %vm292_vm0, %v2643_v44, %v2621_v38 }
 0x11d   : > { %v296_v33 = vsel %vm292_vm0, %v2627_v39, %v2651_v47  ;;  %v299_v38 = vsel %vm292_vm0, %v2653_v48, %v2629_v40  ;;  %v347_v44 = vmul.f32 %v338_v31, %v327_v21  ;;  %v330_v21 = vmul.f32 %v2665_v52, %v295_v15 }
 0x11e   : > { %4631 = vst [vmem:[#allocation59_spill] sm:$0xff] %v2973_v1  ;;  %4632 = vst [vmem:[#allocation60_spill] sm:$0xff] %v2976_v49  ;;  %v2994_v32 = vpop.permute.xlu1 %711  ;;  %v2996_v49 = vpop.permute.xlu0 %709  ;;  %v300_v1 = vsel %vm292_vm0, %v2651_v47, %v2627_v39  ;;  %v2078_v39 = vld [vmem:[%s4474_s2 + $0xc] sm:$0x3]  ;;  %v332_v40 = vmul.f32 %v2663_v51, %v296_v33  ;;  %v329_v48 = vmul.f32 %v2665_v52, %v299_v38 }
 0x11f   : > { %4633 = vst [vmem:[#allocation61_spill] sm:$0xff] %v2994_v32  ;;  %4634 = vst [vmem:[#allocation62_spill] sm:$0xff] %v2996_v49  ;;  %1258 = vrot.lane.b32.xlu1 %v2860_v4, %s2286_s11  ;;  %v348_v49 = vmul.f32 %v342_v14, %v328_v61  ;;  %v325_v32 = vmul.f32 %v2657_v50, %v297_v62  ;;  %1256 = vrot.lane.b32.xlu0 %v2863_v57, %s2286_s11 }
 0x120   : > { %v331_v47 = vmul.f32 %v2663_v51, %v300_v1  ;;  %v266_v61 = vmul.f32 %v2605_v34, %v2407_v6  ;;  %v267_v50 = vmul.f32 %v2605_v34, %v2427_v10  ;;  %v269_v62 = vmul.f32 %v2613_v36, %v2424_v9 }
 0x121   : > { %v272_v51 = vmul.f32 %v2611_v35, %v2414_v7  ;;  %v273_v52 = vmul.f32 %v2611_v35, %v2434_v11  ;;  %v3047_v34 = vrot.slane %v2078_v39, %v2904_v58  ;;  %v3050_v36 = vrot.slane %v2078_v39, %v2907_v13 }
 0x122   : > { %v3035_v57 = vpop.permute.xlu1 %715  ;;  %v3037_v1 = vpop.permute.xlu0 %713  ;;  %v3052_v15 = vadd.f32 %v347_v44, %v268_v41  ;;  %v3054_v33 = vadd.f32 %v348_v49, %v269_v62  ;;  %v345_v38 = vmul.f32 %v338_v31, %v325_v32  ;;  %v351_v35 = vmul.f32 %v338_v31, %v331_v47  ;;  %v2083_v47 = vld [vmem:[%s4474_s2 + $0xe] sm:$0x3] }
 0x123   : > { %4635 = vst [vmem:[#allocation63_spill] sm:$0xff] %v3035_v57  ;;  %4636 = vst [vmem:[#allocation64_spill] sm:$0xff] %v3037_v1  ;;  %1262 = vrot.lane.b32.xlu1 %v2874_v24, %s2286_s11  ;;  %v346_v1 = vmul.f32 %v342_v14, %v326_v43  ;;  %1260 = vrot.lane.b32.xlu0 %v2877_v0, %s2286_s11  ;;  %v352_v57 = vmul.f32 %v342_v14, %v332_v40 }
 0x124   : > { %4637 = vst [vmem:[#allocation65_spill] sm:$0xff] %v3047_v34  ;;  %v349_v4 = vmul.f32 %v338_v31, %v329_v48  ;;  %v350_v11 = vmul.f32 %v342_v14, %v330_v21  ;;  %v379_v34 = vsel %vm377_vm1, %v2671_v53, %v2693_v59  ;;  %v383_v49 = vsel %vm377_vm1, %v2693_v59, %v2671_v53 }
 0x125   : > { %v378_v43 = vsel %vm377_vm1, %v2673_v54, %v2695_v60  ;;  %v382_v14 = vsel %vm377_vm1, %v2695_v60, %v2673_v54  ;;  %v381_v32 = vsel %vm377_vm1, %v2679_v55, %v2703_v63  ;;  %v385_v53 = vsel %vm377_vm1, %v2703_v63, %v2679_v55 }
 0x126   : > { %v3074_v31 = vpop.permute.xlu1 %738  ;;  %v380_v59 = vsel %vm377_vm1, %v2681_v56, %v2705_v2  ;;  %v384_v54 = vsel %vm377_vm1, %v2705_v2, %v2681_v56  ;;  %v3092_v60 = vpop.permute.xlu0 %733  ;;  %v413_v44 = vmul.f32 %v2707_v25, %v383_v49  ;;  %v414_v39 = vmul.f32 %v2707_v25, %v379_v34  ;;  %v4641_v34 = vld [vmem:[#allocation13_spill] sm:$0xff]  ;;  %v4644_v49 = vld [vmem:[#allocation16_spill] sm:$0xff] }
 0x127   : > { %1283 = vperm.xlu1 %2211, %v2486_v17   ;;  %v411_v55 = vmul.f32 %v2709_v26, %v382_v14  ;;  %v412_v63 = vmul.f32 %v2709_v26, %v378_v43  ;;  %1278 = vperm.xlu0 %2210, %v2491_v18   ;;  %v417_v56 = vmul.f32 %v2715_v27, %v385_v53 }
 0x128   : > { %v418_v2 = vmul.f32 %v2715_v27, %v381_v32  ;;  %v415_v17 = vmul.f32 %v2717_v28, %v384_v54  ;;  %v416_v40 = vmul.f32 %v2717_v28, %v380_v59  ;;  %v3107_v48 = vadd.f32 %v345_v38, %v266_v61  ;;  %v4645_v32 = vld [vmem:[#allocation17_spill] sm:$0xff]  ;;  %v4647_v59 = vld [vmem:[#allocation32_spill] sm:$0xff]  ;;  %v4648_v54 = vld [vmem:[#allocation14_spill] sm:$0xff] }
 0x129   : > { %v3109_v25 = vadd.f32 %v346_v1, %v267_v50  ;;  %v3111_v21 = vadd.f32 %v351_v35, %v272_v51  ;;  %v3113_v26 = vadd.f32 %v352_v57, %v273_v52  ;;  %v3118_v41 = vadd.f32 %v349_v4, %v2980_v22  ;;  %v2088_v51 = vld [vmem:[%s4474_s2 + $0x10] sm:$0x3] }
 0x12a   : > { %v3115_v18 = vpop.permute.xlu1 %748  ;;  %v3121_v62 = vadd.f32 %v350_v11, %v2984_v16  ;;  %v3123_v27 = vpop.permute.xlu0 %743  ;;  %v3127_v28 = vrot.slane %v2083_v47, %v2904_v58  ;;  %v3130_v61 = vrot.slane %v2083_v47, %v2907_v13  ;;  %v3133_v57 = vmul.f32 %v2949_v42, %v413_v44  ;;  %v4649_v44 = vld [vmem:[#allocation11_spill] sm:$0xff] }
 0x12b   : > { %4638 = vst [vmem:[#allocation66_spill] sm:$0xff] %v3123_v27  ;;  %1293 = vperm.xlu1 %2211, %v2498_v19   ;;  %v3136_v50 = vmul.f32 %v2952_v30, %v414_v39  ;;  %v3139_v4 = vmul.f32 %v2949_v42, %v411_v55  ;;  %v3142_v11 = vmul.f32 %v2952_v30, %v412_v63  ;;  %v4650_v63 = vld [vmem:[#allocation33_spill] sm:$0xff] }
 0x12c   : > { %4639 = vst [vmem:[#allocation67_spill] sm:$0xff] %v3127_v28  ;;  %4640 = vst [vmem:[#allocation68_spill] sm:$0xff] %v3130_v61  ;;  %1288 = vperm.xlu0 %2210, %v2503_v20   ;;  %v3146_v19 = vmul.f32 %v2949_v42, %v417_v56  ;;  %v3149_v22 = vmul.f32 %v2952_v30, %v418_v2  ;;  %v3152_v16 = vmul.f32 %v2949_v42, %v415_v17  ;;  %v4642_v42 = vld [vmem:[#allocation10_spill] sm:$0xff]  ;;  %v4661_v28 = vld [vmem:[#allocation19_spill] sm:$0xff] }
 0x12d   : > { %v3155_v1 = vmul.f32 %v2952_v30, %v416_v40  ;;  %v458_v20 = vsel %vm456_vm2, %v2723_v29, %v2745_v45  ;;  %v462_v52 = vsel %vm456_vm2, %v2745_v45, %v2723_v29  ;;  %v457_v30 = vsel %vm456_vm2, %v4642_v42, %v4641_v34 }
 0x12e   : > { %v461_v38 = vsel %vm456_vm2, %v4641_v34, %v4642_v42  ;;  %v3176_v35 = vpop.permute.xlu1 %790  ;;  %v492_v43 = vmul.f32 %v4644_v49, %v462_v52  ;;  %v493_v14 = vmul.f32 %v4644_v49, %v458_v20  ;;  %v491_v29 = vmul.f32 %v4645_v32, %v457_v30  ;;  %v3182_v45 = vpop.permute.xlu0 %788  ;;  %v4653_v52 = vld [vmem:[#allocation18_spill] sm:$0xff]  ;;  %v4655_v30 = vld [vmem:[#allocation48_spill] sm:$0xff] }
 0x12f   : > { %4643 = vst [vmem:[#allocation13_spill] sm:$0xff] %v3176_v35  ;;  %v490_v53 = vmul.f32 %v4645_v32, %v461_v38  ;;  %4646 = vst [vmem:[#allocation10_spill] sm:$0xff] %v3182_v45  ;;  %1326 = vrot.lane.b32.xlu1 %v4647_v59, %s2287_s6  ;;  %v460_v39 = vsel %vm456_vm2, %v4649_v44, %v4648_v54  ;;  %v464_v55 = vsel %vm456_vm2, %v4648_v54, %v4649_v44 }
 0x130   : > { %1324 = vrot.lane.b32.xlu0 %v4650_v63, %s2287_s6  ;;  %v3198_v47 = vrot.slane %v2088_v51, %v2904_v58  ;;  %v3201_v56 = vrot.slane %v2088_v51, %v2907_v13  ;;  %v965_v2 = vrot.slane %v2424_v9, 1  ;;  %v966_v17 = vrot.slane %v2417_v8, 1  ;;  %v4658_v58 = vld [vmem:[#allocation15_spill] sm:$0xff] }
 0x131   : > { %v967_v40 = vrot.slane %v2437_v12, 1  ;;  %v964_v20 = vrot.slane %v2404_v5, 1  ;;  %v496_v34 = vmul.f32 %v4653_v52, %v464_v55  ;;  %vm972_vm4 = vcmp.lt.s32.totalorder %v4655_v30, 7  ;;  %v4657_v55 = vld [vmem:[#allocation36_spill] sm:$0xff] }
 0x132   : > { %4651 = vst [vmem:[#allocation16_spill] sm:$0xff] %v3198_v47  ;;  %4652 = vst [vmem:[#allocation17_spill] sm:$0xff] %v3201_v56  ;;  %v3208_v42 = vpop.permute.xlu1 %794  ;;  %v963_v38 = vrot.slane %v2427_v10, 1  ;;  %v962_v49 = vrot.slane %v2407_v6, 1  ;;  %v513_v51 = vmul.f32 %v2959_v46, %v492_v43  ;;  %v514_v32 = vmul.f32 %v2962_v37, %v493_v14  ;;  %v3217_v13 = vpop.permute.xlu0 %792  ;;  %v4659_v56 = vld [vmem:[#allocation12_spill] sm:$0xff] }
 0x133   : > { %4654 = vst [vmem:[#allocation32_spill] sm:$0xff] %v3208_v42  ;;  %v511_v54 = vmul.f32 %v2959_v46, %v490_v53  ;;  %v512_v44 = vmul.f32 %v2962_v37, %v491_v29  ;;  %4656 = vst [vmem:[#allocation14_spill] sm:$0xff] %v3217_v13  ;;  %1330 = vrot.lane.b32.xlu1 %v4657_v55, %s2287_s6  ;;  %v459_v47 = vsel %vm456_vm2, %v4659_v56, %v4658_v58  ;;  %v4660_v53 = vld [vmem:[#allocation5_spill] sm:$0xff] }
 0x134   : > { %v463_v43 = vsel %vm456_vm2, %v4658_v58, %v4659_v56  ;;  %1328 = vrot.lane.b32.xlu0 %v2849_v3, %s2287_s6  ;;  %v968_v14 = vrot.slane %v2414_v7, 1  ;;  %v969_v29 = vrot.slane %v4660_v53, 1  ;;  %v497_v61 = vmul.f32 %v4653_v52, %v460_v39 }
 0x135   : > { %v494_v13 = vmul.f32 %v4661_v28, %v463_v43  ;;  %v495_v42 = vmul.f32 %v4661_v28, %v459_v47  ;;  %v3238_v45 = vsel %vm972_vm4, %v965_v2, %v967_v40  ;;  %v517_v35 = vmul.f32 %v2959_v46, %v496_v34 }
 0x136   : > { %4662 = vst [vmem:[#allocation11_spill] sm:$0xff] %v3238_v45  ;;  %v3241_v58 = vpop.permute.xlu1 %798  ;;  %v3245_v56 = vsel %vm972_vm4, %v964_v20, %v966_v17  ;;  %v3249_v27 = vsel %vm972_vm4, %v963_v38, %v965_v2  ;;  %v3253_v39 = vsel %vm972_vm4, %v962_v49, %v964_v20  ;;  %v3256_v28 = vadd.f32 %v513_v51, %v3052_v15  ;;  %v3267_v43 = vpop.permute.xlu0 %796  ;;  %v4666_v2 = vld [vmem:[#allocation40_spill] sm:$0xff]  ;;  %v4667_v20 = vld [vmem:[#allocation41_spill] sm:$0xff]  ;;  %v4688_v45 = vld [vmem:[#allocation30_spill] sm:$0xff] }
 0x137   : > { %4663 = vst [vmem:[#allocation33_spill] sm:$0xff] %v3245_v56  ;;  %4664 = vst [vmem:[#allocation18_spill] sm:$0xff] %v3249_v27  ;;  %v3259_v47 = vadd.f32 %v514_v32, %v3054_v33  ;;  %v3262_v52 = vadd.f32 %v511_v54, %v3107_v48  ;;  %v3265_v34 = vadd.f32 %v512_v44, %v3109_v25  ;;  %1334 = vrot.lane.b32.xlu1 %v4666_v2, %s2287_s6 }
 0x138   : > { %4665 = vst [vmem:[#allocation36_spill] sm:$0xff] %v3253_v39  ;;  %1332 = vrot.lane.b32.xlu0 %v4667_v20, %s2287_s6  ;;  %v3275_v15 = vsel %vm972_vm4, %v968_v14, %v962_v49  ;;  %v3279_v33 = vsel %vm972_vm4, %v969_v29, %v963_v38  ;;  %v3283_v48 = vsel %vm972_vm4, %v966_v17, %v968_v14  ;;  %v1024_v49 = vrot.slane %v2424_v9, 7  ;;  %v4672_v14 = vld [vmem:[#allocation24_spill] sm:$0xff]  ;;  %v4687_v39 = vld [vmem:[#allocation7_spill] sm:$0xff] }
 0x139   : > { %4668 = vst [vmem:[#allocation15_spill] sm:$0xff] %v3275_v15  ;;  %4669 = vst [vmem:[#allocation12_spill] sm:$0xff] %v3279_v33  ;;  %v3287_v25 = vsel %vm972_vm4, %v967_v40, %v969_v29  ;;  %v518_v51 = vmul.f32 %v2962_v37, %v497_v61  ;;  %v515_v32 = vmul.f32 %v2959_v46, %v494_v13  ;;  %vm1029_vm5 = vcmp.lt.s32.totalorder %v4655_v30, 1  ;;  %v4673_v29 = vld [vmem:[#allocation20_spill] sm:$0xff]  ;;  %v4674_v13 = vld [vmem:[#allocation25_spill] sm:$0xff] }
 0x13a   : > { %4670 = vst [vmem:[#allocation5_spill] sm:$0xff] %v3283_v48  ;;  %4671 = vst [vmem:[#allocation19_spill] sm:$0xff] %v3287_v25  ;;  %v516_v54 = vmul.f32 %v2962_v37, %v495_v42  ;;  %v3294_v44 = vadd.f32 %v517_v35, %v3111_v21  ;;  %v3296_v38 = vpop.permute.xlu1 %802  ;;  %v1021_v17 = vrot.slane %v2407_v6, 7  ;;  %v1022_v40 = vrot.slane %v2427_v10, 7  ;;  %v4675_v37 = vld [vmem:[#allocation21_spill] sm:$0xff]  ;;  %v3318_v10 = vpop.permute.xlu0 %800  ;;  %v4677_v61 = vld [vmem:[#allocation28_spill] sm:$0xff] }
 0x13b   : > { %v545_v46 = vsel %vm543_vm3, %v4673_v29, %v4672_v14  ;;  %v549_v9 = vsel %vm543_vm3, %v4672_v14, %v4673_v29  ;;  %v544_v21 = vsel %vm543_vm3, %v4675_v37, %v4674_v13  ;;  %v548_v6 = vsel %vm543_vm3, %v4674_v13, %v4675_v37  ;;  %4676 = vst [vmem:[#allocation40_spill] sm:$0xff] %v3318_v10  ;;  %v4678_v14 = vld [vmem:[#allocation29_spill] sm:$0xff]  ;;  %v4686_v15 = vld [vmem:[#allocation58_spill] sm:$0xff] }
 0x13c   : > { %1338 = vrot.lane.b32.xlu1 %v2874_v24, %s2287_s6  ;;  %v579_v35 = vmul.f32 %v4677_v61, %v549_v9  ;;  %v580_v42 = vmul.f32 %v4677_v61, %v545_v46  ;;  %v577_v29 = vmul.f32 %v4678_v14, %v548_v6  ;;  %v578_v25 = vmul.f32 %v4678_v14, %v544_v21 }
 0x13d   : > { %1336 = vrot.lane.b32.xlu0 %v2877_v0, %s2287_s6  ;;  %v3329_v13 = vadd.f32 %v518_v51, %v3113_v26  ;;  %v3332_v37 = vadd.f32 %v515_v32, %v3118_v41  ;;  %v3335_v48 = vadd.f32 %v516_v54, %v3121_v62  ;;  %v1023_v9 = vrot.slane %v2404_v5, 7  ;;  %v4679_v26 = vld [vmem:[#allocation26_spill] sm:$0xff]  ;;  %v4681_v62 = vld [vmem:[#allocation27_spill] sm:$0xff]  ;;  %v4685_v54 = vld [vmem:[#allocation57_spill] sm:$0xff] }
 0x13e   : > { %v3338_v33 = vpop.permute.xlu1 %825  ;;  %v1027_v46 = vrot.slane %v2414_v7, 7  ;;  %v1028_v21 = vrot.slane %v4660_v53, 7  ;;  %v1025_v6 = vrot.slane %v2417_v8, 7  ;;  %v1026_v61 = vrot.slane %v2437_v12, 7  ;;  %v4680_v51 = vld [vmem:[#allocation22_spill] sm:$0xff]  ;;  %v4682_v32 = vld [vmem:[#allocation23_spill] sm:$0xff]  ;;  %v3360_v12 = vpop.permute.xlu0 %820 }
 0x13f   : > { %v547_v41 = vsel %vm543_vm3, %v4680_v51, %v4679_v26  ;;  %v551_v5 = vsel %vm543_vm3, %v4679_v26, %v4680_v51  ;;  %v546_v7 = vsel %vm543_vm3, %v4682_v32, %v4681_v62  ;;  %v550_v8 = vsel %vm543_vm3, %v4681_v62, %v4682_v32  ;;  %4683 = vst [vmem:[#allocation41_spill] sm:$0xff] %v3360_v12  ;;  %v4684_v53 = vld [vmem:[#allocation6_spill] sm:$0xff]  ;;  %v4689_v32 = vld [vmem:[#allocation31_spill] sm:$0xff] }
 0x140   : > { %1359 = vperm.xlu1 %2211, %v4684_v53   ;;  %v600_v14 = vmul.f32 %v4685_v54, %v579_v35  ;;  %v601_v27 = vmul.f32 %v4686_v15, %v580_v42  ;;  %v598_v26 = vmul.f32 %v4685_v54, %v577_v29  ;;  %v599_v51 = vmul.f32 %v4686_v15, %v578_v25  ;;  %v4694_v29 = vld [vmem:[#allocation8_spill] sm:$0xff] }
 0x141   : > { %1354 = vperm.xlu0 %2210, %v4687_v39   ;;  %v583_v56 = vmul.f32 %v4688_v45, %v551_v5  ;;  %v584_v62 = vmul.f32 %v4688_v45, %v547_v41  ;;  %v581_v10 = vmul.f32 %v4689_v32, %v550_v8  ;;  %v582_v53 = vmul.f32 %v4689_v32, %v546_v7  ;;  %v4699_v32 = vld [vmem:[#allocation9_spill] sm:$0xff] }
 0x142   : > { %v3373_v12 = vpop.permute.xlu1 %835  ;;  %v3377_v35 = vsel %vm1029_vm5, %v1021_v17, %v1023_v9  ;;  %v3381_v25 = vsel %vm1029_vm5, %v1022_v40, %v1024_v49  ;;  %v3385_v39 = vsel %vm1029_vm5, %v1028_v21, %v1022_v40  ;;  %v3389_v45 = vsel %vm1029_vm5, %v1027_v46, %v1021_v17  ;;  %v3391_v42 = vpop.permute.xlu0 %830 }
 0x143   : > { %4690 = vst [vmem:[#allocation24_spill] sm:$0xff] %v3377_v35  ;;  %4691 = vst [vmem:[#allocation20_spill] sm:$0xff] %v3381_v25  ;;  %v3396_v41 = vsel %vm1029_vm5, %v1025_v6, %v1027_v46  ;;  %v3400_v5 = vsel %vm1029_vm5, %v1026_v61, %v1028_v21  ;;  %v3404_v40 = vsel %vm1029_vm5, %v1023_v9, %v1025_v6 }
 0x144   : > { %4692 = vst [vmem:[#allocation25_spill] sm:$0xff] %v3385_v39  ;;  %4693 = vst [vmem:[#allocation21_spill] sm:$0xff] %v3389_v45  ;;  %1369 = vperm.xlu1 %2211, %v4694_v29   ;;  %v3408_v17 = vsel %vm1029_vm5, %v1024_v49, %v1026_v61  ;;  %v3411_v7 = vadd.f32 %v600_v14, %v3133_v57  ;;  %v3414_v8 = vadd.f32 %v601_v27, %v3136_v50  ;;  %v4700_v61 = vld [vmem:[#allocation42_spill] sm:$0xff] }
 0x145   : > { %4695 = vst [vmem:[#allocation28_spill] sm:$0xff] %v3396_v41  ;;  %4696 = vst [vmem:[#allocation29_spill] sm:$0xff] %v3400_v5  ;;  %v3417_v46 = vadd.f32 %v598_v26, %v3139_v4  ;;  %v3420_v21 = vadd.f32 %v599_v51, %v3142_v11  ;;  %1364 = vperm.xlu0 %2210, %v4699_v32   ;;  %v604_v9 = vmul.f32 %v4685_v54, %v583_v56  ;;  %v4701_v14 = vld [vmem:[#allocation34_spill] sm:$0xff]  ;;  %v4702_v4 = vld [vmem:[#allocation43_spill] sm:$0xff] }
 0x146   : > { %4697 = vst [vmem:[#allocation26_spill] sm:$0xff] %v3404_v40  ;;  %4698 = vst [vmem:[#allocation22_spill] sm:$0xff] %v3408_v17  ;;  %v605_v6 = vmul.f32 %v4686_v15, %v584_v62  ;;  %v602_v49 = vmul.f32 %v4685_v54, %v581_v10  ;;  %v603_v57 = vmul.f32 %v4686_v15, %v582_v53  ;;  %v4703_v11 = vld [vmem:[#allocation35_spill] sm:$0xff]  ;;  %v3443_v10 = vpop.permute.xlu1 %877  ;;  %v4704_v54 = vld [vmem:[#allocation44_spill] sm:$0xff] }
 0x147   : > { %v632_v27 = vsel %vm630_vm6, %v4701_v14, %v4700_v61  ;;  %v636_v50 = vsel %vm630_vm6, %v4700_v61, %v4701_v14  ;;  %v631_v56 = vsel %vm630_vm6, %v4703_v11, %v4702_v4  ;;  %v635_v15 = vsel %vm630_vm6, %v4702_v4, %v4703_v11  ;;  %v4705_v26 = vld [vmem:[#allocation38_spill] sm:$0xff]  ;;  %v3455_v61 = vpop.permute.xlu0 %875  ;;  %v4707_v14 = vld [vmem:[#allocation45_spill] sm:$0xff]  ;;  %v4708_v4 = vld [vmem:[#allocation39_spill] sm:$0xff] }
 0x148   : > { %v634_v51 = vsel %vm630_vm6, %v4705_v26, %v4704_v54  ;;  %v638_v62 = vsel %vm630_vm6, %v4704_v54, %v4705_v26  ;;  %v4706_v53 = vld [vmem:[#allocation46_spill] sm:$0xff]  ;;  %1410 = vrot.lane.b32.xlu1 %v4647_v59, %s2288_s16  ;;  %v633_v11 = vsel %vm630_vm6, %v4708_v4, %v4707_v14  ;;  %v637_v30 = vsel %vm630_vm6, %v4707_v14, %v4708_v4  ;;  %v4709_v54 = vld [vmem:[#allocation47_spill] sm:$0xff] }
 0x149   : > { %v666_v29 = vmul.f32 %v4706_v53, %v632_v27  ;;  %v667_v32 = vmul.f32 %v4706_v53, %v636_v50  ;;  %v664_v26 = vmul.f32 %v4709_v54, %v631_v56  ;;  %v665_v27 = vmul.f32 %v4709_v54, %v635_v15  ;;  %1408 = vrot.lane.b32.xlu0 %v4650_v63, %s2288_s16  ;;  %v4710_v50 = vld [vmem:[#allocation49_spill] sm:$0xff]  ;;  %v4711_v40 = vld [vmem:[#allocation50_spill] sm:$0xff] }
 0x14a   : > { %v670_v53 = vmul.f32 %v4710_v50, %v634_v51  ;;  %v671_v17 = vmul.f32 %v4710_v50, %v638_v62  ;;  %v668_v5 = vmul.f32 %v4711_v40, %v633_v11  ;;  %v669_v41 = vmul.f32 %v4711_v40, %v637_v30  ;;  %v3488_v51 = vpop.permute.xlu1 %881  ;;  %v4712_v62 = vld [vmem:[#allocation59_spill] sm:$0xff]  ;;  %v4713_v11 = vld [vmem:[#allocation60_spill] sm:$0xff]  ;;  %v4714_v40 = vld [vmem:[#allocation61_spill] sm:$0xff] }
 0x14b   : > { %v3476_v39 = vadd.f32 %v604_v9, %v3146_v19  ;;  %v3479_v14 = vadd.f32 %v605_v6, %v3149_v22  ;;  %v3482_v56 = vadd.f32 %v602_v49, %v3152_v16  ;;  %v3485_v15 = vadd.f32 %v603_v57, %v3155_v1  ;;  %v4715_v19 = vld [vmem:[#allocation53_spill] sm:$0xff]  ;;  %v3500_v1 = vpop.permute.xlu0 %879 }
 0x14c   : > { %v687_v4 = vmul.f32 %v4712_v62, %v666_v29  ;;  %v688_v30 = vmul.f32 %v4713_v11, %v667_v32  ;;  %v719_v22 = vsel %vm717_vm7, %v4715_v19, %v4714_v40  ;;  %v723_v16 = vsel %vm717_vm7, %v4714_v40, %v4715_v19  ;;  %1414 = vrot.lane.b32.xlu1 %v4657_v55, %s2288_s16  ;;  %v4716_v40 = vld [vmem:[#allocation62_spill] sm:$0xff] }
 0x14d   : > { %v685_v9 = vmul.f32 %v4712_v62, %v664_v26  ;;  %v686_v6 = vmul.f32 %v4713_v11, %v665_v27  ;;  %v753_v49 = vmul.f32 %v3074_v31, %v719_v22  ;;  %v754_v57 = vmul.f32 %v3074_v31, %v723_v16  ;;  %1412 = vrot.lane.b32.xlu0 %v2849_v3, %s2288_s16  ;;  %v4717_v19 = vld [vmem:[#allocation54_spill] sm:$0xff]  ;;  %v4718_v27 = vld [vmem:[#allocation63_spill] sm:$0xff] }
 0x14e   : > { %v691_v29 = vmul.f32 %v4712_v62, %v670_v53  ;;  %v692_v32 = vmul.f32 %v4713_v11, %v671_v17  ;;  %v689_v54 = vmul.f32 %v4712_v62, %v668_v5  ;;  %v690_v50 = vmul.f32 %v4713_v11, %v669_v41  ;;  %v4719_v22 = vld [vmem:[#allocation55_spill] sm:$0xff]  ;;  %v3530_v5 = vpop.permute.xlu1 %885  ;;  %v4720_v17 = vld [vmem:[#allocation64_spill] sm:$0xff] }
 0x14f   : > { %v718_v26 = vsel %vm717_vm7, %v4717_v19, %v4716_v40  ;;  %v722_v31 = vsel %vm717_vm7, %v4716_v40, %v4717_v19  ;;  %v721_v53 = vsel %vm717_vm7, %v4719_v22, %v4718_v27  ;;  %v725_v41 = vsel %vm717_vm7, %v4718_v27, %v4719_v22  ;;  %v4721_v62 = vld [vmem:[#allocation56_spill] sm:$0xff]  ;;  %v3542_v45 = vpop.permute.xlu0 %883  ;;  %v4722_v27 = vld [vmem:[#allocation65_spill] sm:$0xff] }
 0x150   : > { %v720_v11 = vsel %vm717_vm7, %v4721_v62, %v4720_v17  ;;  %v724_v16 = vsel %vm717_vm7, %v4720_v17, %v4721_v62  ;;  %v751_v40 = vmul.f32 %v3092_v60, %v718_v26  ;;  %v752_v19 = vmul.f32 %v3092_v60, %v722_v31  ;;  %1418 = vrot.lane.b32.xlu1 %v4666_v2, %s2288_s16  ;;  %v4723_v31 = vld [vmem:[#allocation66_spill] sm:$0xff] }
 0x151   : > { %v774_v22 = vmul.f32 %v4722_v27, %v753_v49  ;;  %v775_v25 = vmul.f32 %v3050_v36, %v754_v57  ;;  %v757_v35 = vmul.f32 %v3115_v18, %v721_v53  ;;  %v758_v3 = vmul.f32 %v3115_v18, %v725_v41  ;;  %1416 = vrot.lane.b32.xlu0 %v4667_v20, %s2288_s16 }
 0x152   : > { %v3553_v26 = vadd.f32 %v687_v4, %v3256_v28  ;;  %v3556_v60 = vadd.f32 %v688_v30, %v3259_v47  ;;  %v755_v17 = vmul.f32 %v4723_v31, %v720_v11  ;;  %v756_v62 = vmul.f32 %v4723_v31, %v724_v16  ;;  %v890_v47 = vpop.permute.xlu1 %889 }
 0x153   : > { %v3562_v49 = vadd.f32 %v685_v9, %v3262_v52  ;;  %v3565_v18 = vadd.f32 %v686_v6, %v3265_v34  ;;  %v3568_v57 = vadd.f32 %v691_v29, %v3294_v44  ;;  %v3571_v28 = vadd.f32 %v692_v32, %v3329_v13  ;;  %v888_v9 = vpop.permute.xlu0 %887 }
 0x154   : > { %v3574_v4 = vadd.f32 %v689_v54, %v3332_v37  ;;  %v3577_v30 = vadd.f32 %v690_v50, %v3335_v48  ;;  %v772_v53 = vmul.f32 %v4722_v27, %v751_v40  ;;  %v773_v52 = vmul.f32 %v3050_v36, %v752_v19  ;;  %1422 = vrot.lane.b32.xlu1 %v2874_v24, %s2288_s16  ;;  %v2116_v48 = vld [vmem:[%s4473_s1 + $0x68] sm:$0xff]  ;;  %v4727_v40 = vld [vmem:[#allocation41_spill] sm:$0xff] }
 0x155   : > { %v3584_v34 = vadd.f32 %v774_v22, %v3411_v7  ;;  %v3587_v44 = vadd.f32 %v775_v25, %v3414_v8  ;;  %v778_v13 = vmul.f32 %v4722_v27, %v757_v35  ;;  %v779_v37 = vmul.f32 %v3050_v36, %v758_v3  ;;  %1420 = vrot.lane.b32.xlu0 %v2877_v0, %s2288_s16  ;;  %v4724_v7 = vld [vmem:[#allocation13_spill] sm:$0xff]  ;;  %v4725_v8 = vld [vmem:[#allocation10_spill] sm:$0xff] }
 0x156   : > { %v776_v6 = vmul.f32 %v4722_v27, %v755_v17  ;;  %v777_v29 = vmul.f32 %v3050_v36, %v756_v62  ;;  %v806_v25 = vsel %vm804_vm8, %v4724_v7, %v3241_v58  ;;  %v810_v3 = vsel %vm804_vm8, %v3241_v58, %v4724_v7  ;;  %v2115_v35 = vld [vmem:[%s4473_s1 + $0x60] sm:$0xff]  ;;  %v913_v41 = vpop.permute.xlu1 %912  ;;  %v4726_v58 = vld [vmem:[#allocation32_spill] sm:$0xff] }
 0x157   : > { %v805_v32 = vsel %vm804_vm8, %v4725_v8, %v3267_v43  ;;  %v809_v36 = vsel %vm804_vm8, %v3267_v43, %v4725_v8  ;;  %v840_v54 = vmul.f32 %v3338_v33, %v806_v25  ;;  %v841_v50 = vmul.f32 %v3338_v33, %v810_v3  ;;  %v908_v43 = vpop.permute.xlu0 %907 }
 0x158   : > { %v808_v11 = vsel %vm804_vm8, %v4726_v58, %v3296_v38  ;;  %v812_v16 = vsel %vm804_vm8, %v3296_v38, %v4726_v58  ;;  %v838_v19 = vmul.f32 %v4727_v40, %v805_v32  ;;  %v839_v27 = vmul.f32 %v4727_v40, %v809_v36  ;;  %1443 = vperm.xlu1 %2211, %v2116_v48   ;;  %v2118_v38 = vld [vmem:[%s4473_s1 + $0x78] sm:$0xff] }
 0x159   : > { %v3630_v22 = vadd.f32 %v772_v53, %v3417_v46  ;;  %v3633_v33 = vadd.f32 %v773_v52, %v3420_v21  ;;  %v844_v31 = vmul.f32 %v3373_v12, %v808_v11  ;;  %v845_v17 = vmul.f32 %v3373_v12, %v812_v16  ;;  %1438 = vperm.xlu0 %2210, %v2115_v35   ;;  %v2117_v12 = vld [vmem:[%s4473_s1 + $0x70] sm:$0xff]  ;;  %v4728_v53 = vld [vmem:[#allocation40_spill] sm:$0xff]  ;;  %v4729_v52 = vld [vmem:[#allocation14_spill] sm:$0xff] }
 0x15a   : > { %v3641_v62 = vadd.f32 %v778_v13, %v3476_v39  ;;  %v3644_v48 = vadd.f32 %v779_v37, %v3479_v14  ;;  %v3647_v46 = vadd.f32 %v776_v6, %v3482_v56  ;;  %v3650_v21 = vadd.f32 %v777_v29, %v3485_v15  ;;  %v4730_v14 = vld [vmem:[#allocation67_spill] sm:$0xff]  ;;  %v4731_v13 = vld [vmem:[#allocation68_spill] sm:$0xff]  ;;  %v923_v15 = vpop.permute.xlu1 %922 }
 0x15b   : > { %v807_v7 = vsel %vm804_vm8, %v4729_v52, %v4728_v53  ;;  %v811_v39 = vsel %vm804_vm8, %v4728_v53, %v4729_v52  ;;  %v861_v56 = vmul.f32 %v4730_v14, %v840_v54  ;;  %v862_v37 = vmul.f32 %v4731_v13, %v841_v50  ;;  %v918_v35 = vpop.permute.xlu0 %917  ;;  %v4733_v53 = vld [vmem:[#allocation17_spill] sm:$0xff] }
 0x15c   : > { %v859_v6 = vmul.f32 %v4730_v14, %v838_v19  ;;  %v860_v29 = vmul.f32 %v4731_v13, %v839_v27  ;;  %v842_v25 = vmul.f32 %v3391_v42, %v807_v7  ;;  %v843_v3 = vmul.f32 %v3391_v42, %v811_v39  ;;  %1453 = vperm.xlu1 %2211, %v2118_v38   ;;  %v4732_v38 = vld [vmem:[#allocation16_spill] sm:$0xff] }
 0x15d   : > { %v865_v8 = vmul.f32 %v4730_v14, %v844_v31  ;;  %v866_v32 = vmul.f32 %v4731_v13, %v845_v17  ;;  %v893_v36 = vsel %vm891_vm9, %v3443_v10, %v3530_v5  ;;  %v897_v54 = vsel %vm891_vm9, %v3530_v5, %v3443_v10  ;;  %1448 = vperm.xlu0 %2210, %v2117_v12  }
 0x15e   : > { %v892_v42 = vsel %vm891_vm9, %v3455_v61, %v3542_v45  ;;  %v896_v50 = vsel %vm891_vm9, %v3542_v45, %v3455_v61  ;;  %v927_v58 = vmul.f32 %v913_v41, %v893_v36  ;;  %v928_v11 = vmul.f32 %v913_v41, %v897_v54  ;;  %v993_v19 = vpop.permute.xlu1 %992  ;;  %v4737_v36 = vld [vmem:[#allocation36_spill] sm:$0xff] }
 0x15f   : > { %v895_v16 = vsel %vm891_vm9, %v3488_v51, %v890_v47  ;;  %v899_v10 = vsel %vm891_vm9, %v890_v47, %v3488_v51  ;;  %v925_v5 = vmul.f32 %v908_v43, %v892_v42  ;;  %v926_v40 = vmul.f32 %v908_v43, %v896_v50  ;;  %v988_v31 = vpop.permute.xlu0 %987  ;;  %v4738_v42 = vld [vmem:[#allocation18_spill] sm:$0xff] }
 0x160   : > { %v894_v27 = vsel %vm891_vm9, %v3500_v1, %v888_v9  ;;  %v898_v45 = vsel %vm891_vm9, %v888_v9, %v3500_v1  ;;  %v931_v61 = vmul.f32 %v923_v15, %v895_v16  ;;  %v932_v41 = vmul.f32 %v923_v15, %v899_v10  ;;  %1494 = vrot.lane.b32.xlu1 %v4647_v59, %s2289_s13 }
 0x161   : > { %v863_v17 = vmul.f32 %v4730_v14, %v842_v25  ;;  %v864_v51 = vmul.f32 %v4731_v13, %v843_v3  ;;  %v929_v47 = vmul.f32 %v918_v35, %v894_v27  ;;  %v930_v43 = vmul.f32 %v918_v35, %v898_v45  ;;  %1492 = vrot.lane.b32.xlu0 %v4650_v63, %s2289_s13 }
 0x162   : > { %v948_v12 = vmul.f32 %v4732_v38, %v927_v58  ;;  %v949_v52 = vmul.f32 %v4733_v53, %v928_v11  ;;  %v870_v1 = vadd.f32 %v862_v37, %v3556_v60  ;;  %v869_v9 = vadd.f32 %v861_v56, %v3553_v26  ;;  %v1003_v39 = vpop.permute.xlu1 %1002  ;;  %v4739_v58 = vld [vmem:[#allocation24_spill] sm:$0xff] }
 0x163   : > { %v946_v7 = vmul.f32 %v4732_v38, %v925_v5  ;;  %v947_v59 = vmul.f32 %v4733_v53, %v926_v40  ;;  %v868_v14 = vadd.f32 %v860_v29, %v3565_v18  ;;  %v867_v13 = vadd.f32 %v859_v6, %v3562_v49  ;;  %v998_v25 = vpop.permute.xlu0 %997  ;;  %v4734_v18 = vld [vmem:[#allocation37_spill] sm:$0xff]  ;;  %v4740_v11 = vld [vmem:[#allocation20_spill] sm:$0xff] }
 0x164   : > { %v952_v15 = vmul.f32 %v4732_v38, %v931_v61  ;;  %v953_v63 = vmul.f32 %v4733_v53, %v932_v41  ;;  %1498 = vrot.lane.b32.xlu1 %v4657_v55, %s2289_s13  ;;  %v873_v60 = vadd.f32 %v865_v8, %v3568_v57  ;;  %v874_v26 = vadd.f32 %v866_v32, %v3571_v28  ;;  %v4735_v55 = vld [vmem:[#allocation33_spill] sm:$0xff]  ;;  %v4736_v57 = vld [vmem:[#allocation11_spill] sm:$0xff] }
 0x165   : > { %v950_v56 = vmul.f32 %v4732_v38, %v929_v47  ;;  %v951_v37 = vmul.f32 %v4733_v53, %v930_v43  ;;  %1496 = vrot.lane.b32.xlu0 %v4734_v18, %s2289_s13  ;;  %v871_v49 = vadd.f32 %v863_v17, %v3574_v4  ;;  %v872_v6 = vadd.f32 %v864_v51, %v3577_v30  ;;  %v4741_v5 = vld [vmem:[#allocation21_spill] sm:$0xff]  ;;  %v4743_v51 = vld [vmem:[#allocation15_spill] sm:$0xff]  ;;  %v4744_v47 = vld [vmem:[#allocation12_spill] sm:$0xff] }
 0x166   : > { %v956_v29 = vadd.f32 %v948_v12, %v3584_v34  ;;  %v957_v3 = vadd.f32 %v949_v52, %v3587_v44  ;;  %v1007_v35 = vmul.f32 %v993_v19, %v4735_v55  ;;  %v1008_v8 = vmul.f32 %v993_v19, %v4736_v57  ;;  %v1051_v4 = vpop.permute.xlu1 %1050  ;;  %v4742_v19 = vld [vmem:[#allocation25_spill] sm:$0xff]  ;;  %v4745_v38 = vld [vmem:[#allocation28_spill] sm:$0xff] }
 0x167   : > { %v954_v28 = vadd.f32 %v946_v7, %v3630_v22  ;;  %v955_v32 = vadd.f32 %v947_v59, %v3633_v33  ;;  %v1005_v54 = vmul.f32 %v988_v31, %v4737_v36  ;;  %v1006_v50 = vmul.f32 %v988_v31, %v4738_v42  ;;  %v1046_v10 = vpop.permute.xlu0 %1045  ;;  %v4746_v53 = vld [vmem:[#allocation29_spill] sm:$0xff]  ;;  %v4748_v7 = vld [vmem:[#allocation19_spill] sm:$0xff] }
 0x168   : > { %v960_v30 = vadd.f32 %v952_v15, %v3641_v62  ;;  %v961_v34 = vadd.f32 %v953_v63, %v3644_v48  ;;  %v1065_v44 = vmul.f32 %v1051_v4, %v4739_v58  ;;  %v1066_v16 = vmul.f32 %v1051_v4, %v4740_v11  ;;  %1502 = vrot.lane.b32.xlu1 %v4666_v2, %s2289_s13  ;;  %v4750_v15 = vld [vmem:[#allocation22_spill] sm:$0xff]  ;;  %v2122_v4 = vld [vmem:[%s4473_s1 + $0xb0] sm:$0xff] }
 0x169   : > { %v958_v22 = vadd.f32 %v950_v56, %v3647_v46  ;;  %v959_v33 = vadd.f32 %v951_v37, %v3650_v21  ;;  %v1063_v40 = vmul.f32 %v1046_v10, %v4741_v5  ;;  %v1064_v27 = vmul.f32 %v1046_v10, %v4742_v19  ;;  %1500 = vrot.lane.b32.xlu0 %v4667_v20, %s2289_s13  ;;  %v3811_v19 = vld [vmem:[%s2401_s17 + $0x40] sm:$0xff] }
 0x16a   : > { %v1015_v62 = vadd.f32 %v1007_v35, %v956_v29  ;;  %v1016_v48 = vadd.f32 %v1008_v8, %v957_v3  ;;  %v1073_v45 = vadd.f32 %v1065_v44, %v869_v9  ;;  %v1074_v61 = vadd.f32 %v1066_v16, %v870_v1  ;;  %v1061_v46 = vpop.permute.xlu1 %1060  ;;  %v4747_v1 = vld [vmem:[#allocation5_spill] sm:$0xff] }
 0x16b   : > { %v1013_v41 = vadd.f32 %v1005_v54, %v954_v28  ;;  %v1014_v31 = vadd.f32 %v1006_v50, %v955_v32  ;;  %v1071_v2 = vadd.f32 %v1063_v40, %v867_v13  ;;  %v1072_v17 = vadd.f32 %v1064_v27, %v868_v14  ;;  %v1056_v20 = vpop.permute.xlu0 %1055  ;;  %v4749_v14 = vld [vmem:[#allocation26_spill] sm:$0xff]  ;;  %v2120_v29 = vld [vmem:[%s4473_s1 + $0xa0] sm:$0xff]  ;;  %v3806_v40 = vld [vmem:[%s2401_s17 + $0x50] sm:$0xff] }
 0x16c   : > { %v1011_v21 = vmul.f32 %v1003_v39, %v4743_v51  ;;  %v1012_v43 = vmul.f32 %v1003_v39, %v4744_v47  ;;  %v1069_v12 = vmul.f32 %v1061_v46, %v4745_v38  ;;  %v1070_v52 = vmul.f32 %v1061_v46, %v4746_v53  ;;  %1506 = vrot.lane.b32.xlu1 %v2874_v24, %s2289_s13  ;;  %v2121_v39 = vld [vmem:[%s4473_s1 + $0xa8] sm:$0xff]  ;;  %v3844_v51 = vld [vmem:[%s2401_s17 + $0x78] sm:$0xff] }
 0x16d   : > { %v1009_v9 = vmul.f32 %v998_v25, %v4747_v1  ;;  %v1010_v59 = vmul.f32 %v998_v25, %v4748_v7  ;;  %v1067_v13 = vmul.f32 %v1056_v20, %v4749_v14  ;;  %v1068_v63 = vmul.f32 %v1056_v20, %v4750_v15  ;;  %1504 = vrot.lane.b32.xlu0 %v2877_v0, %s2289_s13  ;;  %v2126_v47 = vld [vmem:[%s4473_s1 + $0xc8] sm:$0xff]  ;;  %v2128_v53 = vld [vmem:[%s4473_s1 + $0xd8] sm:$0xff] }
 0x16e   : > { %v1081_v56 = vadd.f32 %v1073_v45, %v1015_v62  ;;  %v1082_v24 = vadd.f32 %v1074_v61, %v1016_v48  ;;  %v1077_v37 = vadd.f32 %v1069_v12, %v873_v60  ;;  %v1078_v18 = vadd.f32 %v1070_v52, %v874_v26  ;;  %v3768_v57 = vpop.permute.xlu1 %1094  ;;  %v3820_v48 = vld [vmem:[%s2401_s17 + $0x70] sm:$0xff]  ;;  %v3825_v45 = vld [vmem:[%s2401_s17 + $0x60] sm:$0xff] }
 0x16f   : > { %v1079_v25 = vadd.f32 %v1071_v2, %v1013_v41  ;;  %v1080_v3 = vadd.f32 %v1072_v17, %v1014_v31  ;;  %v1075_v55 = vadd.f32 %v1067_v13, %v871_v49  ;;  %v1076_v35 = vadd.f32 %v1068_v63, %v872_v6  ;;  %4751 = vst [vmem:[#allocation27_spill] sm:$0xff] %v3768_v57  ;;  %v3772_v36 = vpop.permute.xlu0 %1089  ;;  %v2123_v49 = vld [vmem:[%s4473_s1 + $0xb8] sm:$0xff]  ;;  %v3839_v2 = vld [vmem:[%s2401_s17 + $0x48] sm:$0xff]  ;;  %v2127_v52 = vld [vmem:[%s4473_s1 + $0xd0] sm:$0xff] }
 0x170   : > { %v1019_v0 = vadd.f32 %v1011_v21, %v960_v30  ;;  %v1020_v8 = vadd.f32 %v1012_v43, %v961_v34  ;;  %v1109_v28 = vadd.f32 %v3768_v57, %v1081_v56  ;;  %v1110_v32 = vadd.f32 %v3768_v57, %v1082_v24  ;;  %4752 = vst [vmem:[#allocation23_spill] sm:$0xff] %v3772_v36  ;;  %v3834_v31 = vld [vmem:[%s2401_s17 + $0x58] sm:$0xff]  ;;  %v3849_v21 = vld [vmem:[%s2401_s17 + $0x68] sm:$0xff]  ;;  %v2125_v43 = vld [vmem:[%s4473_s1 + $0xc0] sm:$0xff]  ;;  %s4757_s17 = smov 111  }
 0x171   : > { %1527 = vperm.xlu1 %2211, %v2121_v39   ;;  %v1017_v60 = vadd.f32 %v1009_v9, %v958_v22  ;;  %v1018_v26 = vadd.f32 %v1010_v59, %v959_v33  ;;  %v1107_v54 = vadd.f32 %v3772_v36, %v1079_v25  ;;  %v1108_v42 = vadd.f32 %v3772_v36, %v1080_v3 }
 0x172   : > { %1522 = vperm.xlu0 %2210, %v2120_v29   ;;  %v1085_v6 = vadd.f32 %v1077_v37, %v1019_v0  ;;  %v1086_v50 = vadd.f32 %v1078_v18, %v1020_v8  ;;  %1117 = vst [vmem:[%s3780_s23 + $0x10] sm:$0xff] %v1109_v28  ;;  %1118 = vst [vmem:[%s3780_s23 + $0x18] sm:$0xff] %v1110_v32  ;;  %v3789_v58 = vpop.permute.xlu1 %1104  ;;  %v2130_v0 = vld [vmem:[%s4473_s1 + $0xe0] sm:$0xff]  ;;  %v1884_v36 = vrot.slane %v3811_v19, 7  ;;  %v1885_v57 = vrot.slane %v3839_v2, 7 }
 0x173   : > { %v1083_v30 = vadd.f32 %v1075_v55, %v1017_v60  ;;  %v1084_v34 = vadd.f32 %v1076_v35, %v1018_v26  ;;  %1115 = vst [vmem:[%s3780_s23] sm:$0xff] %v1107_v54  ;;  %1116 = vst [vmem:[%s3780_s23 + $0x8] sm:$0xff] %v1108_v42  ;;  %v3793_v16 = vpop.permute.xlu0 %1099  ;;  %v2131_v35 = vld [vmem:[%s4473_s1 + $0xe8] sm:$0xff]  ;;  %v2133_v42 = vld [vmem:[%s4473_s1 + $0xf8] sm:$0xff] }
 0x174   : > { %4753 = vst [vmem:[#allocation6_spill] sm:$0xff] %v3789_v58  ;;  %v1113_v44 = vadd.f32 %v3789_v58, %v1085_v6  ;;  %v1114_v11 = vadd.f32 %v3789_v58, %v1086_v50  ;;  %4754 = vst [vmem:[#allocation57_spill] sm:$0xff] %v3793_v16 }
 0x175   : > { %1537 = vperm.xlu1 %2211, %v2123_v49   ;;  %v1111_v10 = vadd.f32 %v3793_v16, %v1083_v30  ;;  %v1112_v22 = vadd.f32 %v3793_v16, %v1084_v34  ;;  %v2132_v49 = vld [vmem:[%s4473_s1 + $0xf0] sm:$0xff] }
 0x176   : > { %1532 = vperm.xlu0 %2210, %v2122_v4   ;;  %1121 = vst [vmem:[%s3780_s23 + $0x30] sm:$0xff] %v1113_v44  ;;  %1122 = vst [vmem:[%s3780_s23 + $0x38] sm:$0xff] %v1114_v11  ;;  %v3801_v33 = vpop.permute.xlu1 %1143  ;;  %v2136_v11 = vld [vmem:[%s4473_s1 + $0x108] sm:$0xff] }
 0x177   : > { %1119 = vst [vmem:[%s3780_s23 + $0x20] sm:$0xff] %v1111_v10  ;;  %1120 = vst [vmem:[%s3780_s23 + $0x28] sm:$0xff] %v1112_v22  ;;  %v3803_v5 = vpop.permute.xlu0 %1138  ;;  %v2135_v10 = vld [vmem:[%s4473_s1 + $0x100] sm:$0xff] }
 0x179   : > { %1578 = vrot.lane.b32.xlu1 %v3806_v40, %s2290_s10 }
 0x17a   : > { %1576 = vrot.lane.b32.xlu0 %v3811_v19, %s2290_s10  ;;  %v3815_v27 = vpop.permute.xlu1 %1153 }
 0x17b   : > { %v3817_v62 = vpop.permute.xlu0 %1148 }
 0x17d   : > { %1582 = vrot.lane.b32.xlu1 %v3820_v48, %s2290_s10 }
 0x17e   : > { %1580 = vrot.lane.b32.xlu0 %v3825_v45, %s2290_s10  ;;  %v3829_v61 = vpop.permute.xlu1 %1166 }
 0x17f   : > { %v3831_v41 = vpop.permute.xlu0 %1164 }
 0x181   : > { %1586 = vrot.lane.b32.xlu1 %v3834_v31, %s2290_s10 }
 0x182   : > { %1584 = vrot.lane.b32.xlu0 %v3839_v2, %s2290_s10  ;;  %v1171_v17 = vpop.permute.xlu1 %1170 }
 0x183   : > { %v1169_v46 = vpop.permute.xlu0 %1168 }
 0x185   : > { %1590 = vrot.lane.b32.xlu1 %v3844_v51, %s2290_s10 }
 0x186   : > { %1588 = vrot.lane.b32.xlu0 %v3849_v21, %s2290_s10  ;;  %v3859_v38 = vpop.permute.xlu1 %1174 }
 0x187   : > { %v3861_v12 = vpop.permute.xlu0 %1172 }
 0x189   : > { %1611 = vperm.xlu1 %2211, %v2126_v47  }
 0x18a   : > { %1606 = vperm.xlu0 %2210, %v2125_v43   ;;  %v1179_v20 = vpop.permute.xlu1 %1178 }
 0x18b   : > { %v1177_v1 = vpop.permute.xlu0 %1176  ;;  %v1183_v59 = vsel %vm292_vm0, %v1171_v17, %v1179_v20  ;;  %v1187_v14 = vsel %vm292_vm0, %v1179_v20, %v1171_v17  ;;  %v2137_v20 = vld [vmem:[%s4473_s1 + $0x110] sm:$0xff] }
 0x18c   : > { %v1182_v15 = vsel %vm292_vm0, %v1169_v46, %v1177_v1  ;;  %v1186_v63 = vsel %vm292_vm0, %v1177_v1, %v1169_v46 }
 0x18d   : > { %1621 = vperm.xlu1 %2211, %v2128_v53  }
 0x18e   : > { %1616 = vperm.xlu0 %2210, %v2127_v52   ;;  %v3869_v9 = vpop.permute.xlu1 %1199  ;;  %v2138_v52 = vld [vmem:[%s4473_s1 + $0x118] sm:$0xff] }
 0x18f   : > { %v3871_v7 = vpop.permute.xlu0 %1194 }
 0x191   : > { %1662 = vrot.lane.b32.xlu1 %v3806_v40, %s2291_s9 }
 0x192   : > { %1660 = vrot.lane.b32.xlu0 %v3811_v19, %s2291_s9  ;;  %v1210_v13 = vpop.permute.xlu1 %1209 }
 0x193   : > { %v3885_v39 = vmul.f32 %v1210_v13, %v1187_v14  ;;  %v3887_v56 = vmul.f32 %v1210_v13, %v1183_v59  ;;  %v1205_v24 = vpop.permute.xlu0 %1204 }
 0x194   : > { %v3891_v37 = vmul.f32 %v1205_v24, %v1186_v63  ;;  %v3893_v18 = vmul.f32 %v1205_v24, %v1182_v15  ;;  %v1845_v24 = vld [vmem:[%s4475_s3 + $0x8] sm:$0xff] }
 0x195   : > { %1666 = vrot.lane.b32.xlu1 %v3820_v48, %s2291_s9 }
 0x196   : > { %1664 = vrot.lane.b32.xlu0 %v3825_v45, %s2291_s9  ;;  %v1251_v29 = vpop.permute.xlu1 %1250 }
 0x197   : > { %v1249_v25 = vpop.permute.xlu0 %1248 }
 0x199   : > { %1670 = vrot.lane.b32.xlu1 %v3834_v31, %s2291_s9 }
 0x19a   : > { %1668 = vrot.lane.b32.xlu0 %v3839_v2, %s2291_s9  ;;  %v1255_v3 = vpop.permute.xlu1 %1254 }
 0x19b   : > { %v1253_v55 = vpop.permute.xlu0 %1252 }
 0x19d   : > { %1674 = vrot.lane.b32.xlu1 %v3844_v51, %s2291_s9 }
 0x19e   : > { %1672 = vrot.lane.b32.xlu0 %v3849_v21, %s2291_s9  ;;  %v1259_v8 = vpop.permute.xlu1 %1258  ;;  %s2224_s9 = sshll.u32 %s2293_s15, 4  ;;  %s2225_s9 = int_to_ptr.vmem [resolvable:$false] %s2224_s9 }
 0x19f   : > { %v1265_v28 = vsel %vm377_vm1, %v1251_v29, %v1259_v8  ;;  %v1269_v32 = vsel %vm377_vm1, %v1259_v8, %v1251_v29  ;;  %v1257_v60 = vpop.permute.xlu0 %1256  ;;  %v1844_v29 = vld [vmem:[%s4475_s3] sm:$0xff]  ;;  %s2226_s25 = scalar_lea.vmem %s2225_s9, 4096  ;;  %p2227_p0 = scmp.lt.s32.totalorder %s4424_s8, %s2225_s9 }
 0x1a0   : > { %v1264_v26 = vsel %vm377_vm1, %v1249_v25, %v1257_v60  ;;  %v1268_v54 = vsel %vm377_vm1, %v1257_v60, %v1249_v25  ;;  %v4755_v60 = vld [vmem:[#allocation51_spill] sm:$0xff]  ;;  %p2228_p1 = scmp.lt.s32.totalorder %s2226_s25, %s2220_s14 }
 0x1a1   : > { %1695 = vperm.xlu1 %2211, %v2131_v35   ;;  %v1846_v35 = vld [vmem:[%s4475_s3 + $0x10] sm:$0xff] }
 0x1a2   : > { %1690 = vperm.xlu0 %2210, %v2130_v0   ;;  %v1263_v6 = vpop.permute.xlu1 %1262  ;;  %v1220_v0 = vld [vmem:[%s4474_s2] sm:$0x3]  ;;  %p2229_p2 = por %p2228_p1, %p2227_p0 }
 0x1a3   : > { %v1267_v50 = vsel %vm377_vm1, %v1255_v3, %v1263_v6  ;;  %v1271_v4 = vsel %vm377_vm1, %v1263_v6, %v1255_v3  ;;  %v1261_v30 = vpop.permute.xlu0 %1260  ;;  %v1181_v6 = vsel %vm292_vm0, %v3829_v61, %v3859_v38 }
 0x1a4   : > { %v1266_v34 = vsel %vm377_vm1, %v1253_v55, %v1261_v30  ;;  %v1270_v44 = vsel %vm377_vm1, %v1261_v30, %v1253_v55  ;;  %v1847_v55 = vld [vmem:[%s4475_s3 + $0x18] sm:$0xff]  ;;  %v1184_v30 = vsel %vm292_vm0, %v3861_v12, %v3831_v41  ;;  %p2230_p3 = pnand %p2229_p2, %p2223_p13 }
 0x1a5   : > { %1705 = vperm.xlu1 %2211, %v2133_v42  }
 0x1a6   : > { %1700 = vperm.xlu0 %2210, %v2132_v49   ;;  %v1284_v22 = vpop.permute.xlu1 %1283  ;;  %v2140_v49 = vld [vmem:[%s4475_s3 + $0x20] sm:$0xff] }
 0x1a7   : > { %v3939_v17 = vmul.f32 %v1284_v22, %v1269_v32  ;;  %v3941_v46 = vmul.f32 %v1284_v22, %v1265_v28  ;;  %v1279_v47 = vpop.permute.xlu0 %1278  ;;  %v2141_v32 = vld [vmem:[%s4475_s3 + $0x28] sm:$0xff]  ;;  %v2114_v22 = vld [vmem:[%s4474_s2 + $0x4] sm:$0x3] }
 0x1a8   : > { %v3943_v43 = vmul.f32 %v1279_v47, %v1268_v54  ;;  %v3945_v53 = vmul.f32 %v1279_v47, %v1264_v26  ;;  %v1225_v26 = vrot.slane %v1220_v0, %v4755_v60  ;;  %v4756_v54 = vld [vmem:[#allocation52_spill] sm:$0xff]  ;;  %v1212_v47 = vmul.f32 %v3871_v7, %v1184_v30 }
 0x1a9   : > { %1779 = vperm.xlu1 %2211, %v2136_v11   ;;  %v1229_v42 = vrot.slane %v1220_v0, %v4756_v54  ;;  %v1215_v11 = vmul.f32 %v3869_v9, %v1181_v6  ;;  %v1158_v6 = vmul.f32 %v3806_v40, %v3801_v33  ;;  %v1162_v30 = vmul.f32 %v3820_v48, %v3815_v27 }
 0x1aa   : > { %1774 = vperm.xlu0 %2210, %v2135_v10   ;;  %v1294_v1 = vpop.permute.xlu1 %1293 }
 0x1ab   : > { %v3953_v59 = vmul.f32 %v1294_v1, %v1271_v4  ;;  %v3955_v14 = vmul.f32 %v1294_v1, %v1267_v50  ;;  %v1289_v13 = vpop.permute.xlu0 %1288  ;;  %v1185_v50 = vsel %vm292_vm0, %v3859_v38, %v3829_v61  ;;  %v1180_v4 = vsel %vm292_vm0, %v3831_v41, %v3861_v12 }
 0x1ac   : > { %v3957_v15 = vmul.f32 %v1289_v13, %v1270_v44  ;;  %v3959_v63 = vmul.f32 %v1289_v13, %v1266_v34  ;;  %v1214_v44 = vmul.f32 %v3869_v9, %v1185_v50  ;;  %v1213_v41 = vmul.f32 %v3871_v7, %v1180_v4 }
 0x1ad   : > { %1789 = vperm.xlu1 %2211, %v2138_v52   ;;  %v2143_v52 = vld [vmem:[%s4475_s3 + $0x38] sm:$0xff]  ;;  %v1385_v13 = vrot.slane %v2114_v22, %v4755_v60  ;;  %v1389_v7 = vrot.slane %v2114_v22, %v4756_v54  ;;  %v1159_v50 = vmul.f32 %v3834_v31, %v3801_v33  ;;  %v1157_v4 = vmul.f32 %v3839_v2, %v3803_v5 }
 0x1ae   : > { %1784 = vperm.xlu0 %2210, %v2137_v20   ;;  %v1327_v25 = vpop.permute.xlu1 %1326  ;;  %v2142_v20 = vld [vmem:[%s4475_s3 + $0x30] sm:$0xff]  ;;  %v1233_v0 = vmul.f32 %v1229_v42, %v1213_v41 }
 0x1af   : > { %v1325_v3 = vpop.permute.xlu0 %1324 }
 0x1b1   : > { %1855 = vperm.xlu1 %2211, %v1845_v24   ;;  %v1234_v24 = vmul.f32 %v1225_v26, %v1214_v44  ;;  %v1161_v44 = vmul.f32 %v3849_v21, %v3817_v62 }
 0x1b2   : > { %1850 = vperm.xlu0 %2210, %v1844_v29   ;;  %v1331_v8 = vpop.permute.xlu1 %1330  ;;  %v1235_v29 = vmul.f32 %v1229_v42, %v1215_v11 }
 0x1b3   : > { %v1329_v28 = vpop.permute.xlu0 %1328  ;;  %v1242_v33 = vadd.f32 %v1234_v24, %v1158_v6 }
 0x1b5   : > { %1865 = vperm.xlu1 %2211, %v1847_v55  }
 0x1b6   : > { %1860 = vperm.xlu0 %2210, %v1846_v35   ;;  %v1335_v34 = vpop.permute.xlu1 %1334  ;;  %v1232_v35 = vmul.f32 %v1225_v26, %v1212_v47 }
 0x1b7   : > { %v1341_v10 = vsel %vm456_vm2, %v1327_v25, %v1335_v34  ;;  %v1345_v61 = vsel %vm456_vm2, %v1335_v34, %v1327_v25  ;;  %v1333_v38 = vpop.permute.xlu0 %1332  ;;  %v1163_v34 = vmul.f32 %v3844_v51, %v3815_v27  ;;  %v1238_v27 = vmul.f32 %v1225_v26, %v3885_v39 }
 0x1b8   : > { %v1340_v12 = vsel %vm456_vm2, %v1325_v3, %v1333_v38  ;;  %v1344_v9 = vsel %vm456_vm2, %v1333_v38, %v1325_v3  ;;  %v1243_v38 = vadd.f32 %v1235_v29, %v1159_v50 }
 0x1b9   : > { %1911 = vperm.xlu1 %2211, %v2141_v32  }
 0x1ba   : > { %1906 = vperm.xlu0 %2210, %v2140_v49   ;;  %v1339_v1 = vpop.permute.xlu1 %1338 }
 0x1bb   : > { %v1343_v25 = vsel %vm456_vm2, %v1331_v8, %v1339_v1  ;;  %v1347_v3 = vsel %vm456_vm2, %v1339_v1, %v1331_v8  ;;  %v1337_v55 = vpop.permute.xlu0 %1336  ;;  %v1156_v8 = vmul.f32 %v3811_v19, %v3803_v5 }
 0x1bc   : > { %v1342_v32 = vsel %vm456_vm2, %v1329_v28, %v1337_v55  ;;  %v1346_v49 = vsel %vm456_vm2, %v1337_v55, %v1329_v28  ;;  %v1160_v28 = vmul.f32 %v3825_v45, %v3817_v62  ;;  %v1239_v62 = vmul.f32 %v1229_v42, %v3887_v56 }
 0x1bd   : > { %1921 = vperm.xlu1 %2211, %v2143_v52   ;;  %v1240_v5 = vadd.f32 %v1232_v35, %v1156_v8  ;;  %v1241_v52 = vadd.f32 %v1233_v0, %v1157_v4 }
 0x1be   : > { %1916 = vperm.xlu0 %2210, %v2142_v20  }
 0x1bf   : > { %v1360_v11 = vpop.permute.xlu1 %1359 }
 0x1c0   : > { %v1374_v22 = vmul.f32 %v1360_v11, %v1345_v61  ;;  %v1375_v47 = vmul.f32 %v1360_v11, %v1341_v10  ;;  %v1355_v41 = vpop.permute.xlu0 %1354  ;;  %v1236_v61 = vmul.f32 %v1225_v26, %v3891_v37  ;;  %v1237_v10 = vmul.f32 %v1229_v42, %v3893_v18 }
 0x1c1   : > { %1746 = vrot.lane.b32.xlu1 %v3806_v40, %s4757_s17  ;;  %v1372_v20 = vmul.f32 %v1355_v41, %v1344_v9  ;;  %v1373_v1 = vmul.f32 %v1355_v41, %v1340_v12  ;;  %v1246_v18 = vadd.f32 %v1238_v27, %v1162_v30  ;;  %v1247_v42 = vadd.f32 %v1239_v62, %v1163_v34  ;;  %v2119_v62 = vld [vmem:[%s4474_s2 + $0x6] sm:$0x3] }
 0x1c2   : > { %1744 = vrot.lane.b32.xlu0 %v3811_v19, %s4757_s17  ;;  %v1394_v55 = vmul.f32 %v1385_v13, %v1374_v22  ;;  %v1395_v24 = vmul.f32 %v1389_v7, %v1375_v47 }
 0x1c3   : > { %v1392_v29 = vmul.f32 %v1385_v13, %v1372_v20  ;;  %v1393_v6 = vmul.f32 %v1389_v7, %v1373_v1  ;;  %v1370_v50 = vpop.permute.xlu1 %1369  ;;  %v2109_v1 = vld [vmem:[%s4474_s2 + $0x2] sm:$0x3] }
 0x1c4   : > { %v4055_v35 = vadd.f32 %v1394_v55, %v1242_v33  ;;  %v4057_v9 = vadd.f32 %v1395_v24, %v1243_v38  ;;  %v1378_v12 = vmul.f32 %v1370_v50, %v1347_v3  ;;  %v1379_v0 = vmul.f32 %v1370_v50, %v1343_v25  ;;  %v1365_v8 = vpop.permute.xlu0 %1364 }
 0x1c5   : > { %1750 = vrot.lane.b32.xlu1 %v3820_v48, %s4757_s17  ;;  %v4061_v39 = vadd.f32 %v1392_v29, %v1240_v5  ;;  %v4063_v56 = vadd.f32 %v1393_v6, %v1241_v52  ;;  %v1376_v37 = vmul.f32 %v1365_v8, %v1346_v49  ;;  %v1377_v26 = vmul.f32 %v1365_v8, %v1342_v32 }
 0x1c6   : > { %1748 = vrot.lane.b32.xlu0 %v3825_v45, %s4757_s17  ;;  %v1398_v4 = vmul.f32 %v1385_v13, %v1378_v12  ;;  %v1399_v11 = vmul.f32 %v1389_v7, %v1379_v0  ;;  %v1244_v33 = vadd.f32 %v1236_v61, %v1160_v28  ;;  %v1245_v3 = vadd.f32 %v1237_v10, %v1161_v44 }
 0x1c7   : > { %v1396_v25 = vmul.f32 %v1385_v13, %v1376_v37  ;;  %v1397_v38 = vmul.f32 %v1389_v7, %v1377_v26  ;;  %v1411_v22 = vpop.permute.xlu1 %1410  ;;  %v1309_v6 = vrot.slane %v2109_v1, %v4755_v60  ;;  %v1313_v50 = vrot.slane %v2109_v1, %v4756_v54 }
 0x1c8   : > { %v4067_v47 = vadd.f32 %v1398_v4, %v1246_v18  ;;  %v4069_v41 = vadd.f32 %v1399_v11, %v1247_v42  ;;  %v1409_v5 = vpop.permute.xlu0 %1408  ;;  %v1469_v12 = vrot.slane %v2119_v62, %v4755_v60  ;;  %v1473_v0 = vrot.slane %v2119_v62, %v4756_v54 }
 0x1c9   : > { %1754 = vrot.lane.b32.xlu1 %v3834_v31, %s4757_s17  ;;  %v4073_v32 = vadd.f32 %v1396_v25, %v1244_v33  ;;  %v4075_v49 = vadd.f32 %v1397_v38, %v1245_v3  ;;  %v1318_v11 = vmul.f32 %v1309_v6, %v3939_v17  ;;  %v1319_v33 = vmul.f32 %v1313_v50, %v3941_v46 }
 0x1ca   : > { %1752 = vrot.lane.b32.xlu0 %v3839_v2, %s4757_s17  ;;  %v1316_v38 = vmul.f32 %v1309_v6, %v3943_v43  ;;  %v1322_v43 = vmul.f32 %v1309_v6, %v3953_v59 }
 0x1cb   : > { %v1415_v30 = vpop.permute.xlu1 %1414 }
 0x1cc   : > { %v1413_v34 = vpop.permute.xlu0 %1412 }
 0x1cd   : > { %1758 = vrot.lane.b32.xlu1 %v3844_v51, %s4757_s17 }
 0x1ce   : > { %1756 = vrot.lane.b32.xlu0 %v3849_v21, %s4757_s17  ;;  %s2160_s17 = sshll.u32 %s2346_s22, 11  ;;  %s4430_s22 = scalar_lea.sflag [#allocation3], %s218_s26 }
 0x1cf   : > { %v1419_v13 = vpop.permute.xlu1 %1418  ;;  %s4420_s16 = scalar_lea.hbm %s4477_s5, %s2160_s17 }
 0x1d0   : > { %v1425_v7 = vsel %vm543_vm3, %v1411_v22, %v1419_v13  ;;  %v1429_v28 = vsel %vm543_vm3, %v1419_v13, %v1411_v22  ;;  %v1417_v44 = vpop.permute.xlu0 %1416  ;;  %v1317_v22 = vmul.f32 %v1313_v50, %v3945_v53  ;;  %v1323_v53 = vmul.f32 %v1313_v50, %v3955_v14 }
 0x1d1   : > { %v1424_v52 = vsel %vm543_vm3, %v1409_v5, %v1417_v44  ;;  %v1428_v20 = vsel %vm543_vm3, %v1417_v44, %v1409_v5 }
 0x1d3   : > { %v1423_v27 = vpop.permute.xlu1 %1422 }
 0x1d4   : > { %v1427_v55 = vsel %vm543_vm3, %v1415_v30, %v1423_v27  ;;  %v1431_v24 = vsel %vm543_vm3, %v1423_v27, %v1415_v30  ;;  %v1421_v61 = vpop.permute.xlu0 %1420 }
 0x1d5   : > { %v1426_v10 = vsel %vm543_vm3, %v1413_v34, %v1421_v61  ;;  %v1430_v29 = vsel %vm543_vm3, %v1421_v61, %v1413_v34  ;;  %v1320_v61 = vmul.f32 %v1309_v6, %v3957_v15 }
 0x1d7   : > { %v1444_v8 = vpop.permute.xlu1 %1443 }
 0x1d8   : > { %v1458_v37 = vmul.f32 %v1444_v8, %v1429_v28  ;;  %v1459_v26 = vmul.f32 %v1444_v8, %v1425_v7  ;;  %v1439_v18 = vpop.permute.xlu0 %1438  ;;  %v1321_v8 = vmul.f32 %v1313_v50, %v3959_v63 }
 0x1d9   : > { %v1456_v42 = vmul.f32 %v1439_v18, %v1428_v20  ;;  %v1457_v4 = vmul.f32 %v1439_v18, %v1424_v52 }
 0x1da   : > { %v1478_v3 = vmul.f32 %v1469_v12, %v1458_v37  ;;  %v1479_v25 = vmul.f32 %v1473_v0, %v1459_v26 }
 0x1db   : > { %v1476_v5 = vmul.f32 %v1469_v12, %v1456_v42  ;;  %v1477_v30 = vmul.f32 %v1473_v0, %v1457_v4  ;;  %v1454_v34 = vpop.permute.xlu1 %1453 }
 0x1dc   : > { %v4113_v13 = vadd.f32 %v1478_v3, %v1318_v11  ;;  %v4115_v28 = vadd.f32 %v1479_v25, %v1319_v33  ;;  %v1462_v7 = vmul.f32 %v1454_v34, %v1431_v24  ;;  %v1463_v44 = vmul.f32 %v1454_v34, %v1427_v55  ;;  %v1449_v52 = vpop.permute.xlu0 %1448  ;;  %v2124_v11 = vld [vmem:[%s4474_s2 + $0xa] sm:$0x3] }
 0x1dd   : > { %v4117_v20 = vadd.f32 %v1476_v5, %v1316_v38  ;;  %v4119_v17 = vadd.f32 %v1477_v30, %v1317_v22  ;;  %v1460_v46 = vmul.f32 %v1449_v52, %v1430_v29  ;;  %v1461_v1 = vmul.f32 %v1449_v52, %v1426_v10 }
 0x1de   : > { %v1482_v27 = vmul.f32 %v1469_v12, %v1462_v7  ;;  %v1483_v62 = vmul.f32 %v1473_v0, %v1463_v44  ;;  %v1553_v5 = vrot.slane %v2124_v11, %v4755_v60  ;;  %v1557_v30 = vrot.slane %v2124_v11, %v4756_v54 }
 0x1df   : > { %v1480_v37 = vmul.f32 %v1469_v12, %v1460_v46  ;;  %v1481_v24 = vmul.f32 %v1473_v0, %v1461_v1  ;;  %v1495_v55 = vpop.permute.xlu1 %1494 }
 0x1e0   : > { %v4125_v26 = vadd.f32 %v1482_v27, %v1322_v43  ;;  %v4127_v18 = vadd.f32 %v1483_v62, %v1323_v53  ;;  %v1493_v42 = vpop.permute.xlu0 %1492 }
 0x1e1   : > { %v4129_v29 = vadd.f32 %v1480_v37, %v1320_v61  ;;  %v4131_v10 = vadd.f32 %v1481_v24, %v1321_v8 }
 0x1e3   : > { %v1499_v59 = vpop.permute.xlu1 %1498 }
 0x1e4   : > { %v1497_v14 = vpop.permute.xlu0 %1496 }
 0x1e7   : > { %v1503_v4 = vpop.permute.xlu1 %1502 }
 0x1e8   : > { %v1509_v15 = vsel %vm630_vm6, %v1495_v55, %v1503_v4  ;;  %v1513_v63 = vsel %vm630_vm6, %v1503_v4, %v1495_v55  ;;  %v1501_v6 = vpop.permute.xlu0 %1500 }
 0x1e9   : > { %v1508_v50 = vsel %vm630_vm6, %v1493_v42, %v1501_v6  ;;  %v1512_v12 = vsel %vm630_vm6, %v1501_v6, %v1493_v42 }
 0x1eb   : > { %v1507_v0 = vpop.permute.xlu1 %1506 }
 0x1ec   : > { %v1511_v33 = vsel %vm630_vm6, %v1499_v59, %v1507_v0  ;;  %v1515_v3 = vsel %vm630_vm6, %v1507_v0, %v1499_v59  ;;  %v1505_v25 = vpop.permute.xlu0 %1504 }
 0x1ed   : > { %v1510_v38 = vsel %vm630_vm6, %v1497_v14, %v1505_v25  ;;  %v1514_v22 = vsel %vm630_vm6, %v1505_v25, %v1497_v14 }
 0x1f0   : > { %v1528_v34 = vpop.permute.xlu1 %1527 }
 0x1f1   : > { %v1542_v7 = vmul.f32 %v1528_v34, %v1509_v15  ;;  %v1543_v44 = vmul.f32 %v1528_v34, %v1513_v63  ;;  %v1523_v52 = vpop.permute.xlu0 %1522 }
 0x1f2   : > { %v1540_v46 = vmul.f32 %v1523_v52, %v1508_v50  ;;  %v1541_v1 = vmul.f32 %v1523_v52, %v1512_v12 }
 0x1f3   : > { %v1562_v43 = vmul.f32 %v1553_v5, %v1542_v7  ;;  %v1563_v53 = vmul.f32 %v1557_v30, %v1543_v44 }
 0x1f4   : > { %v1560_v27 = vmul.f32 %v1553_v5, %v1540_v46  ;;  %v1561_v62 = vmul.f32 %v1557_v30, %v1541_v1  ;;  %v1538_v61 = vpop.permute.xlu1 %1537 }
 0x1f5   : > { %v4155_v8 = vadd.f32 %v1562_v43, %v4055_v35  ;;  %v4158_v37 = vadd.f32 %v1563_v53, %v4057_v9  ;;  %v1546_v24 = vmul.f32 %v1538_v61, %v1511_v33  ;;  %v1547_v55 = vmul.f32 %v1538_v61, %v1515_v3  ;;  %v1533_v42 = vpop.permute.xlu0 %1532 }
 0x1f6   : > { %v4161_v59 = vadd.f32 %v1560_v27, %v4061_v39  ;;  %v4164_v14 = vadd.f32 %v1561_v62, %v4063_v56  ;;  %v1544_v4 = vmul.f32 %v1533_v42, %v1510_v38  ;;  %v1545_v15 = vmul.f32 %v1533_v42, %v1514_v22 }
 0x1f7   : > { %v1566_v63 = vmul.f32 %v1553_v5, %v1546_v24  ;;  %v1567_v6 = vmul.f32 %v1557_v30, %v1547_v55 }
 0x1f8   : > { %v1564_v50 = vmul.f32 %v1553_v5, %v1544_v4  ;;  %v1565_v12 = vmul.f32 %v1557_v30, %v1545_v15  ;;  %v1579_v35 = vpop.permute.xlu1 %1578 }
 0x1f9   : > { %v4167_v0 = vadd.f32 %v1566_v63, %v4067_v47  ;;  %v4170_v9 = vadd.f32 %v1567_v6, %v4069_v41  ;;  %v1577_v11 = vpop.permute.xlu0 %1576 }
 0x1fa   : > { %v4173_v39 = vadd.f32 %v1564_v50, %v4073_v32  ;;  %v4176_v56 = vadd.f32 %v1565_v12, %v4075_v49  ;;  %v2129_v49 = vld [vmem:[%s4474_s2 + $0xc] sm:$0x3] }
 0x1fb   : > { %v1637_v46 = vrot.slane %v2129_v49, %v4755_v60  ;;  %v1641_v1 = vrot.slane %v2129_v49, %v4756_v54 }
 0x1fc   : > { %v1583_v33 = vpop.permute.xlu1 %1582 }
 0x1fd   : > { %v1581_v3 = vpop.permute.xlu0 %1580 }
 0x200   : > { %v1587_v25 = vpop.permute.xlu1 %1586 }
 0x201   : > { %v1593_v38 = vsel %vm717_vm7, %v1579_v35, %v1587_v25  ;;  %v1597_v47 = vsel %vm717_vm7, %v1587_v25, %v1579_v35  ;;  %v1585_v22 = vpop.permute.xlu0 %1584 }
 0x202   : > { %v1592_v41 = vsel %vm717_vm7, %v1577_v11, %v1585_v22  ;;  %v1596_v32 = vsel %vm717_vm7, %v1585_v22, %v1577_v11 }
 0x204   : > { %v1591_v5 = vpop.permute.xlu1 %1590 }
 0x205   : > { %v1595_v30 = vsel %vm717_vm7, %v1583_v33, %v1591_v5  ;;  %v1599_v34 = vsel %vm717_vm7, %v1591_v5, %v1583_v33  ;;  %v1589_v7 = vpop.permute.xlu0 %1588 }
 0x206   : > { %v1594_v44 = vsel %vm717_vm7, %v1581_v3, %v1589_v7  ;;  %v1598_v52 = vsel %vm717_vm7, %v1589_v7, %v1581_v3 }
 0x208   : > { %v1612_v43 = vpop.permute.xlu1 %1611 }
 0x209   : > { %v1626_v53 = vmul.f32 %v1612_v43, %v1593_v38  ;;  %v1627_v27 = vmul.f32 %v1612_v43, %v1597_v47  ;;  %v1607_v62 = vpop.permute.xlu0 %1606 }
 0x20a   : > { %v1624_v61 = vmul.f32 %v1607_v62, %v1592_v41  ;;  %v1625_v24 = vmul.f32 %v1607_v62, %v1596_v32 }
 0x20b   : > { %v1646_v55 = vmul.f32 %v1637_v46, %v1626_v53  ;;  %v1647_v42 = vmul.f32 %v1641_v1, %v1627_v27 }
 0x20c   : > { %v1644_v4 = vmul.f32 %v1637_v46, %v1624_v61  ;;  %v1645_v15 = vmul.f32 %v1641_v1, %v1625_v24  ;;  %v1622_v63 = vpop.permute.xlu1 %1621  ;;  %v1830_v24 = vrot.slane %v3806_v40, 1 }
 0x20d   : > { %v4200_v6 = vadd.f32 %v1646_v55, %v4113_v13  ;;  %v4203_v50 = vadd.f32 %v1647_v42, %v4115_v28  ;;  %v1630_v12 = vmul.f32 %v1622_v63, %v1595_v30  ;;  %v1631_v35 = vmul.f32 %v1622_v63, %v1599_v34  ;;  %v1617_v11 = vpop.permute.xlu0 %1616 }
 0x20e   : > { %v4206_v33 = vadd.f32 %v1644_v4, %v4117_v20  ;;  %v4209_v3 = vadd.f32 %v1645_v15, %v4119_v17  ;;  %v1628_v25 = vmul.f32 %v1617_v11, %v1594_v44  ;;  %v1629_v38 = vmul.f32 %v1617_v11, %v1598_v52  ;;  %v2134_v15 = vld [vmem:[%s4474_s2 + $0xe] sm:$0x3] }
 0x20f   : > { %4758 = vst [vmem:[#allocation58_spill] sm:$0xff] %v4200_v6  ;;  %4759 = vst [vmem:[#allocation7_spill] sm:$0xff] %v4203_v50  ;;  %v1650_v47 = vmul.f32 %v1637_v46, %v1630_v12  ;;  %v1651_v22 = vmul.f32 %v1641_v1, %v1631_v35  ;;  %v1831_v55 = vrot.slane %v3834_v31, 1  ;;  %v1832_v42 = vrot.slane %v3825_v45, 1 }
 0x210   : > { %4760 = vst [vmem:[#allocation30_spill] sm:$0xff] %v4206_v33  ;;  %4761 = vst [vmem:[#allocation31_spill] sm:$0xff] %v4209_v3  ;;  %v1648_v41 = vmul.f32 %v1637_v46, %v1628_v25  ;;  %v1649_v32 = vmul.f32 %v1641_v1, %v1629_v38  ;;  %v1663_v13 = vpop.permute.xlu1 %1662  ;;  %v1833_v4 = vrot.slane %v3849_v21, 1  ;;  %v1828_v63 = vrot.slane %v3811_v19, 1 }
 0x211   : > { %v4212_v5 = vadd.f32 %v1650_v47, %v4125_v26  ;;  %v4215_v28 = vadd.f32 %v1651_v22, %v4127_v18  ;;  %v1661_v49 = vpop.permute.xlu0 %1660  ;;  %v1829_v12 = vrot.slane %v3839_v2, 1  ;;  %v1834_v35 = vrot.slane %v3820_v48, 1 }
 0x212   : > { %v4218_v20 = vadd.f32 %v1648_v41, %v4129_v29  ;;  %v4221_v17 = vadd.f32 %v1649_v32, %v4131_v10  ;;  %v1835_v11 = vrot.slane %v3844_v51, 1  ;;  %v1721_v47 = vrot.slane %v2134_v15, %v4755_v60 }
 0x213   : > { %4762 = vst [vmem:[#allocation8_spill] sm:$0xff] %v4212_v5  ;;  %4763 = vst [vmem:[#allocation9_spill] sm:$0xff] %v4215_v28  ;;  %v1725_v22 = vrot.slane %v2134_v15, %v4756_v54  ;;  %v4254_v32 = vsel %vm972_vm4, %v1830_v24, %v1832_v42  ;;  %v4258_v16 = vsel %vm972_vm4, %v1831_v55, %v1833_v4  ;;  %v1886_v28 = vrot.slane %v3806_v40, 7 }
 0x214   : > { %4764 = vst [vmem:[#allocation42_spill] sm:$0xff] %v4218_v20  ;;  %4765 = vst [vmem:[#allocation34_spill] sm:$0xff] %v4221_v17  ;;  %v1667_v30 = vpop.permute.xlu1 %1666  ;;  %v4262_v58 = vsel %vm972_vm4, %v1828_v63, %v1830_v24  ;;  %v4266_v17 = vsel %vm972_vm4, %v1829_v12, %v1831_v55  ;;  %v4270_v20 = vsel %vm972_vm4, %v1834_v35, %v1828_v63  ;;  %v1887_v24 = vrot.slane %v3834_v31, 7 }
 0x215   : > { %v1665_v34 = vpop.permute.xlu0 %1664  ;;  %v4274_v15 = vsel %vm972_vm4, %v1835_v11, %v1829_v12  ;;  %v1891_v12 = vrot.slane %v3844_v51, 7 }
 0x218   : > { %v1671_v7 = vpop.permute.xlu1 %1670 }
 0x219   : > { %v1669_v44 = vpop.permute.xlu0 %1668  ;;  %v1677_v55 = vsel %vm804_vm8, %v1663_v13, %v1671_v7  ;;  %v1681_v63 = vsel %vm804_vm8, %v1671_v7, %v1663_v13 }
 0x21a   : > { %v1676_v19 = vsel %vm804_vm8, %v1661_v49, %v1669_v44  ;;  %v1680_v40 = vsel %vm804_vm8, %v1669_v44, %v1661_v49  ;;  %v4782_v23 = vld [vmem:[#allocation9_spill] sm:$0xff] }
 0x21c   : > { %v1675_v52 = vpop.permute.xlu1 %1674 }
 0x21d   : > { %v1673_v46 = vpop.permute.xlu0 %1672  ;;  %v1679_v31 = vsel %vm804_vm8, %v1667_v30, %v1675_v52  ;;  %v1683_v2 = vsel %vm804_vm8, %v1675_v52, %v1667_v30  ;;  %v1836_v52 = vsel %vm972_vm4, %v1832_v42, %v1834_v35 }
 0x21e   : > { %v1682_v51 = vsel %vm804_vm8, %v1673_v46, %v1665_v34 }
 0x220   : > { %v1696_v1 = vpop.permute.xlu1 %1695 }
 0x221   : > { %v1691_v43 = vpop.permute.xlu0 %1690  ;;  %v1710_v33 = vmul.f32 %v1696_v1, %v1677_v55 }
 0x222   : > { %v1708_v13 = vmul.f32 %v1691_v43, %v1676_v19  ;;  %v1709_v7 = vmul.f32 %v1691_v43, %v1680_v40  ;;  %v1896_v43 = vsel %vm1029_vm5, %v1884_v36, %v1886_v28 }
 0x224   : > { %v1706_v26 = vpop.permute.xlu1 %1705  ;;  %v1729_v55 = vmul.f32 %v1725_v22, %v1709_v7 }
 0x225   : > { %v1701_v53 = vpop.permute.xlu0 %1700  ;;  %v1714_v50 = vmul.f32 %v1706_v26, %v1679_v31  ;;  %v1715_v6 = vmul.f32 %v1706_v26, %v1683_v2 }
 0x226   : > { %v1713_v44 = vmul.f32 %v1701_v53, %v1682_v51 }
 0x228   : > { %v4223_v27 = vpop.permute.xlu1 %1779  ;;  %v1733_v19 = vmul.f32 %v1725_v22, %v1713_v44 }
 0x229   : > { %4766 = vst [vmem:[#allocation43_spill] sm:$0xff] %v4223_v27  ;;  %v4225_v18 = vpop.permute.xlu0 %1774  ;;  %v1888_v27 = vrot.slane %v3825_v45, 7  ;;  %v2139_v45 = vld [vmem:[%s4474_s2 + $0x10] sm:$0x3] }
 0x22a   : > { %4767 = vst [vmem:[#allocation35_spill] sm:$0xff] %v4225_v18 }
 0x22c   : > { %v4227_v62 = vpop.permute.xlu1 %1789 }
 0x22d   : > { %4768 = vst [vmem:[#allocation44_spill] sm:$0xff] %v4227_v62  ;;  %v4229_v29 = vpop.permute.xlu0 %1784  ;;  %v1711_v62 = vmul.f32 %v1696_v1, %v1681_v63  ;;  %v1837_v1 = vsel %vm972_vm4, %v1833_v4, %v1835_v11  ;;  %v1735_v63 = vmul.f32 %v1725_v22, %v1715_v6  ;;  %v1899_v4 = vsel %vm1029_vm5, %v1891_v12, %v1885_v57 }
 0x22e   : > { %4769 = vst [vmem:[#allocation38_spill] sm:$0xff] %v4229_v29  ;;  %v1890_v29 = vrot.slane %v3820_v48, 7  ;;  %v1678_v48 = vsel %vm804_vm8, %v1665_v34, %v1673_v46  ;;  %v1897_v34 = vsel %vm1029_vm5, %v1885_v57, %v1887_v24  ;;  %v1730_v46 = vmul.f32 %v1721_v47, %v1710_v33 }
 0x22f   : > { %v1712_v49 = vmul.f32 %v1701_v53, %v1678_v48  ;;  %v1731_v26 = vmul.f32 %v1725_v22, %v1711_v62  ;;  %v1728_v53 = vmul.f32 %v1721_v47, %v1708_v13  ;;  %v4327_v57 = vrot.slane %v2139_v45, %v4756_v54 }
 0x230   : > { %v4231_v10 = vpop.permute.xlu1 %1855  ;;  %v1898_v42 = vsel %vm1029_vm5, %v1890_v29, %v1884_v36  ;;  %v1892_v33 = vsel %vm1029_vm5, %v1888_v27, %v1890_v29  ;;  %v4324_v36 = vrot.slane %v2139_v45, %v4755_v60 }
 0x231   : > { %v4233_v61 = vpop.permute.xlu0 %1850  ;;  %v1732_v11 = vmul.f32 %v1721_v47, %v1712_v49  ;;  %v1739_v29 = vadd.f32 %v1731_v26, %v4158_v37  ;;  %v1736_v22 = vadd.f32 %v1728_v53, %v4161_v59  ;;  %v1870_v59 = vmul.f32 %v4231_v10, %v4254_v32 }
 0x233   : > { %v4336_v54 = vadd.f32 %v1732_v11, %v4173_v39 }
 0x234   : > { %v4246_v25 = vpop.permute.xlu1 %1865 }
 0x235   : > { %v4248_v38 = vpop.permute.xlu0 %1860  ;;  %v1874_v39 = vmul.f32 %v4246_v25, %v4270_v20 }
 0x236   : > { %4770 = vst [vmem:[#allocation46_spill] sm:$0xff] %v4248_v38  ;;  %v1889_v38 = vrot.slane %v3849_v21, 7  ;;  %v1734_v21 = vmul.f32 %v1721_v47, %v1714_v50  ;;  %v1894_v50 = vsel %vm1029_vm5, %v1886_v28, %v1888_v27  ;;  %v1738_v47 = vadd.f32 %v1730_v46, %v4155_v8 }
 0x237   : > { %v1743_v27 = vadd.f32 %v1735_v63, %v4170_v9  ;;  %v4339_v8 = vadd.f32 %v1733_v19, %v4176_v56  ;;  %v1869_v9 = vmul.f32 %v4233_v61, %v4266_v17  ;;  %v1875_v56 = vmul.f32 %v4246_v25, %v4274_v15  ;;  %v4773_v25 = vld [vmem:[#allocation43_spill] sm:$0xff] }
 0x238   : > { %v1912_v5 = vpop.permute.xlu1 %1911  ;;  %v1893_v62 = vsel %vm1029_vm5, %v1889_v38, %v1891_v12  ;;  %v1895_v6 = vsel %vm1029_vm5, %v1887_v24, %v1889_v38  ;;  %v1737_v12 = vadd.f32 %v1729_v55, %v4164_v14  ;;  %v1742_v28 = vadd.f32 %v1734_v21, %v4167_v0  ;;  %v4776_v19 = vld [vmem:[#allocation7_spill] sm:$0xff] }
 0x239   : > { %v1907_v3 = vpop.permute.xlu0 %1906  ;;  %v1926_v31 = vmul.f32 %v1912_v5, %v1896_v43  ;;  %v1927_v2 = vmul.f32 %v1912_v5, %v1897_v34  ;;  %v1871_v14 = vmul.f32 %v4231_v10, %v4258_v16  ;;  %v1868_v0 = vmul.f32 %v4233_v61, %v4262_v58 }
 0x23a   : > { %v1924_v60 = vmul.f32 %v1907_v3, %v1898_v42  ;;  %v1925_v41 = vmul.f32 %v1907_v3, %v1899_v4 }
 0x23b   : > { %v1934_v24 = vadd.f32 %v1926_v31, %v1738_v47  ;;  %v1935_v16 = vadd.f32 %v1927_v2, %v1739_v29  ;;  %v4779_v29 = vld [vmem:[#allocation31_spill] sm:$0xff] }
 0x23c   : > { %v1922_v18 = vpop.permute.xlu1 %1921  ;;  %v1932_v7 = vadd.f32 %v1924_v60, %v1736_v22  ;;  %v1933_v48 = vadd.f32 %v1925_v41, %v1737_v12 }
 0x23d   : > { %v1917_v30 = vpop.permute.xlu0 %1916  ;;  %v4772_v3 = vld [vmem:[#allocation46_spill] sm:$0xff]  ;;  %v1930_v10 = vmul.f32 %v1922_v18, %v1892_v33  ;;  %v1931_v13 = vmul.f32 %v1922_v18, %v1893_v62  ;;  %v4777_v62 = vld [vmem:[#allocation44_spill] sm:$0xff] }
 0x23e   : > { %v4354_v5 = vmul.f32 %v4772_v3, %v1836_v52  ;;  %v4357_v32 = vmul.f32 %v4772_v3, %v1837_v1  ;;  %v1928_v44 = vmul.f32 %v1917_v30, %v1894_v50  ;;  %v1929_v52 = vmul.f32 %v1917_v30, %v1895_v6  ;;  %v4774_v1 = vld [vmem:[#allocation35_spill] sm:$0xff]  ;;  %v4778_v6 = vld [vmem:[#allocation30_spill] sm:$0xff] }
 0x23f   : > { %v1938_v46 = vadd.f32 %v1930_v10, %v1742_v28  ;;  %v1939_v26 = vadd.f32 %v1931_v13, %v1743_v27  ;;  %v4780_v3 = vld [vmem:[#allocation38_spill] sm:$0xff] }
 0x240   : > { %v1747_v35 = vpop.permute.xlu1 %1746 }
 0x241   : > { %v1745_v40 = vpop.permute.xlu0 %1744 }
 0x244   : > { %v1751_v38 = vpop.permute.xlu1 %1750 }
 0x245   : > { %v1749_v37 = vpop.permute.xlu0 %1748 }
 0x248   : > { %v1755_v58 = vpop.permute.xlu1 %1754 }
 0x249   : > { %v1761_v17 = vsel %vm891_vm9, %v1747_v35, %v1755_v58  ;;  %v1765_v20 = vsel %vm891_vm9, %v1755_v58, %v1747_v35  ;;  %v1753_v61 = vpop.permute.xlu0 %1752  ;;  %v4775_v35 = vld [vmem:[#allocation58_spill] sm:$0xff] }
 0x24a   : > { %v1794_v15 = vmul.f32 %v4773_v25, %v1761_v17  ;;  %v1795_v51 = vmul.f32 %v4773_v25, %v1765_v20  ;;  %v1760_v49 = vsel %vm891_vm9, %v1745_v40, %v1753_v61  ;;  %v1764_v18 = vsel %vm891_vm9, %v1753_v61, %v1745_v40  ;;  %v4781_v20 = vld [vmem:[#allocation8_spill] sm:$0xff] }
 0x24b   : > { %v1792_v43 = vmul.f32 %v4774_v1, %v1760_v49  ;;  %v1793_v34 = vmul.f32 %v4774_v1, %v1764_v18  ;;  %v4784_v49 = vld [vmem:[#allocation23_spill] sm:$0xff] }
 0x24c   : > { %v1814_v53 = vmul.f32 %v4324_v36, %v1794_v15  ;;  %v1815_v55 = vmul.f32 %v4327_v57, %v1795_v51  ;;  %v1759_v45 = vpop.permute.xlu1 %1758 }
 0x24d   : > { %v1812_v21 = vmul.f32 %v4324_v36, %v1792_v43  ;;  %v1813_v63 = vmul.f32 %v4327_v57, %v1793_v34  ;;  %v1763_v42 = vsel %vm891_vm9, %v1751_v38, %v1759_v45  ;;  %v1767_v30 = vsel %vm891_vm9, %v1759_v45, %v1751_v38  ;;  %v1757_v4 = vpop.permute.xlu0 %1756  ;;  %v4785_v43 = vld [vmem:[#allocation42_spill] sm:$0xff] }
 0x24e   : > { %v1822_v11 = vadd.f32 %v1814_v53, %v4775_v35  ;;  %v1823_v33 = vadd.f32 %v1815_v55, %v4776_v19  ;;  %v1798_v40 = vmul.f32 %v4777_v62, %v1763_v42  ;;  %v1799_v50 = vmul.f32 %v4777_v62, %v1767_v30  ;;  %v4787_v45 = vld [vmem:[#allocation6_spill] sm:$0xff] }
 0x24f   : > { %v1820_v47 = vadd.f32 %v1812_v21, %v4778_v6  ;;  %v1821_v22 = vadd.f32 %v1813_v63, %v4779_v29  ;;  %v1762_v12 = vsel %vm891_vm9, %v1749_v37, %v1757_v4  ;;  %v1766_v31 = vsel %vm891_vm9, %v1757_v4, %v1749_v37 }
 0x250   : > { %v1878_v2 = vadd.f32 %v1870_v59, %v1822_v11  ;;  %v1879_v28 = vadd.f32 %v1871_v14, %v1823_v33  ;;  %v1818_v27 = vmul.f32 %v4324_v36, %v1798_v40  ;;  %v1819_v38 = vmul.f32 %v4327_v57, %v1799_v50 }
 0x251   : > { %v1876_v60 = vadd.f32 %v1868_v0, %v1820_v47  ;;  %v1877_v41 = vadd.f32 %v1869_v9, %v1821_v22  ;;  %v1796_v10 = vmul.f32 %v4780_v3, %v1762_v12  ;;  %v1797_v13 = vmul.f32 %v4780_v3, %v1766_v31  ;;  %v4783_v9 = vld [vmem:[#allocation27_spill] sm:$0xff] }
 0x252   : > { %v1942_v58 = vadd.f32 %v1934_v24, %v1878_v2  ;;  %v1943_v17 = vadd.f32 %v1935_v16, %v1879_v28  ;;  %v1826_v61 = vadd.f32 %v1818_v27, %v4781_v20  ;;  %v1827_v37 = vadd.f32 %v1819_v38, %v4782_v23 }
 0x253   : > { %v1940_v59 = vadd.f32 %v1932_v7, %v1876_v60  ;;  %v1941_v14 = vadd.f32 %v1933_v48, %v1877_v41  ;;  %v1816_v25 = vmul.f32 %v4324_v36, %v1796_v10  ;;  %v1817_v0 = vmul.f32 %v4327_v57, %v1797_v13  ;;  %v4786_v48 = vld [vmem:[#allocation34_spill] sm:$0xff] }
 0x254   : > { %v1950_v15 = vadd.f32 %v1942_v58, %v4783_v9  ;;  %v1951_v51 = vadd.f32 %v1943_v17, %v4783_v9  ;;  %v1882_v24 = vadd.f32 %v1874_v39, %v1826_v61  ;;  %v1883_v16 = vadd.f32 %v1875_v56, %v1827_v37 }
 0x255   : > { %v1948_v18 = vadd.f32 %v1940_v59, %v4784_v49  ;;  %v1949_v1 = vadd.f32 %v1941_v14, %v4784_v49  ;;  %v1824_v7 = vadd.f32 %v1816_v25, %v4785_v43  ;;  %v1825_v36 = vadd.f32 %v1817_v0, %v4786_v48 }
 0x256   : > { %2146 = vst [vmem:[%s3780_s23 + $0x50] sm:$0xff] %v1950_v15  ;;  %2147 = vst [vmem:[%s3780_s23 + $0x58] sm:$0xff] %v1951_v51  ;;  %v1946_v57 = vadd.f32 %v1938_v46, %v1882_v24  ;;  %v1947_v34 = vadd.f32 %v1939_v26, %v1883_v16  ;;  %v1936_v53 = vadd.f32 %v1928_v44, %v4336_v54 }
 0x257   : > { %v1937_v39 = vadd.f32 %v1929_v52, %v4339_v8  ;;  %2144 = vst [vmem:[%s3780_s23 + $0x40] sm:$0xff] %v1948_v18  ;;  %2145 = vst [vmem:[%s3780_s23 + $0x48] sm:$0xff] %v1949_v1  ;;  %v1880_v56 = vadd.f32 %v4354_v5, %v1824_v7  ;;  %v1881_v55 = vadd.f32 %v4357_v32, %v1825_v36  ;;  %v4788_v8 = vld [vmem:[#allocation57_spill] sm:$0xff] }
 0x258   : > { %v1954_v21 = vadd.f32 %v1946_v57, %v4787_v45  ;;  %v1955_v46 = vadd.f32 %v1947_v34, %v4787_v45 }
 0x259   : > { %v1944_v26 = vadd.f32 %v1936_v53, %v1880_v56  ;;  %v1945_v54 = vadd.f32 %v1937_v39, %v1881_v55 }
 0x25a   : > { %2150 = vst [vmem:[%s3780_s23 + $0x70] sm:$0xff] %v1954_v21  ;;  %2151 = vst [vmem:[%s3780_s23 + $0x78] sm:$0xff] %v1955_v46 }
 0x25b   : > { %v1952_v5 = vadd.f32 %v1944_v26, %v4788_v8  ;;  %v1953_v32 = vadd.f32 %v1945_v54, %v4788_v8 }
 0x25d   : > { %2148 = vst [vmem:[%s3780_s23 + $0x60] sm:$0xff] %v1952_v5  ;;  %2149 = vst [vmem:[%s3780_s23 + $0x68] sm:$0xff] %v1953_v32 }
 0x25e   : > { %2233 = shalt.err (!%p2230_p3)
}
 0x25f   : > { %s2234_s26 = scalar_lea.hbm %s4420_s16, 2048  ;;  %s2238_s30 = scalar_lea.hbm %s4477_s5, 4096 }
 0x260   : > { %p2235_p4 = scmp.ne.s32.totalorder %s4420_s16, %s2234_s26  ;;  %p2239_p9 = scmp.lt.u32.totalorder %s4420_s16, %s4477_s5 }
 0x261   : > { %p2240_p10 = scmp.lt.u32.totalorder %s2238_s30, %s2234_s26  ;;  %p2242_p12 = scmp.lt.u32.totalorder %s2234_s26, %s4420_s16 }
 0x262   : > { %p2236_p7 = pnand %p2235_p4, %p2363_p5 }
 0x263   : > { %p2241_p11 = por %p2240_p10, %p2239_p9 }
 0x264   : > { %p2237_p8 = pneg %p2236_p7 }
 0x265   : > { %p2243_p13 = por %p2242_p12, %p2241_p11 }
 0x267   : > { %p2244_p0 = pnand %p2243_p13, %p2237_p8 }
 0x269   : > { %2247 = shalt.err (!%p2244_p0)
}
 0x26a   : > { %s2294_s17 = smov 256  }
 0x26b   : > { %2161 = dma.vmem_to_hbm [thread:$0]  (%p2363_p5), %s4424_s8, 2048, %s4420_s16, %s4430_s22, %s2294_s17, %s2294_s17, %s2286_s11  }
 0x26c PF: > { %p2167_p1 = scmp.ge.s32.totalorder %s2282_s21, 2  ;;  %s1995_s10 = sand.u32 1, %s2270_s18  }
 0x26d   : > { %s1996_s13 = scalar_lea.sflag [#allocation3], %s1995_s10 }
 0x26e   : > { %p2164_p2 = pnand %p2167_p1, %p2367_p6 }
 0x270   : > { %2265 = dma.done.wait (!%p2164_p2), %s1996_s13, 2048  }
 0x271   : > { %2267 = vsyncadd (!%p2164_p2), %s1996_s13, 4294965248  ;;  %p15_p3 = scmp.ge.s32.totalorder %s2350_s24, 4   ;;  %s4789_s18 = smov %s2274_s19 }
 0x272   : > { %s4790_s19 = smov %s2278_s20  ;;  %s4791_s20 = smov %s2361_s27 }
 0x273   : > { %s4792_s21 = smov %s2350_s24  ;;  %17 = sbr.rel (!%p15_p3) target bundleno = 3 (0x3), region = 93 }
 0x27a   :  { %2001 = vsyncpa [#allocation3], 1 }
 0x27b   :  { %2003 = vsyncpa [#allocation3 + $0x1], 1 }

</bundles_post_ra>
